<compile_context>
chip_gen: v6e
topology: v6e:2x2x1
jax: 0.10.0
libtpu: 0.0.40
codegen_flags: <defaults>
</compile_context>

<pallas_src>
import math
import functools

import jax
import jax.numpy as jnp
from jax.experimental import pallas as pl
from jax.experimental.pallas import tpu as pltpu

# 48 MiB scoped-VMEM budget: comfortably above actual per-step footprints
# (<~15 MiB) and below v7x's 64 MiB physical VMEM.  Raise toward 96 MiB on
# v5e/v6e if tiles are grown further.
_VMEM_LIMIT = 48 * 1024 * 1024


# ----------------------------- small helpers --------------------------------

def _round_up(v, m):
    return ((v + m - 1) // m) * m


def _pad2(a, rows, cols):
    pr, pc = rows - a.shape[0], cols - a.shape[1]
    if pr or pc:
        a = jnp.pad(a, ((0, pr), (0, pc)))
    return a


def _pad_rows(a, rows):
    if a.shape[0] != rows:
        a = jnp.pad(a, ((0, rows - a.shape[0]), (0, 0)))
    return a


def _pick_tile(dp, target):
    """Largest multiple-of-128 divisor of dp (itself a multiple of 128) <= target."""
    if dp <= target:
        return dp
    t = max(128, (target // 128) * 128)
    while dp % t:
        t -= 128
    return t


def _gelu_tanh(x):
    # PyTorch nn.GELU(approximate='tanh'), computed in f32.
    c = math.sqrt(2.0 / math.pi)
    return 0.5 * x * (1.0 + jnp.tanh(c * (x + 0.044715 * x * x * x)))


# -------------------------- weight prep (one-time) ---------------------------

def _prep_w(w):
    """Pad both dims of a (K, N) weight to multiples of 128 and cast to bf16."""
    K, N = w.shape
    return _pad2(w, _round_up(K, 128), _round_up(N, 128)).astype(jnp.bfloat16)


def _prep_b(b):
    """Pad a (N,) bias to a multiple of 128, keep f32, store as (1, Np)."""
    N = b.shape[0]
    Np = _round_up(N, 128)
    return jnp.pad(b, (0, Np - N)).astype(jnp.float32).reshape(1, Np)


# ----------------------------- Pallas kernels ------------------------------

def _make_linear_kernel(has_bias, has_residual, activation):
    """K-tiled matmul with f32 VMEM accumulator + fused bias/GELU/residual epilogue."""

    def kernel(*refs):
        x_ref, w_ref = refs[0], refs[1]
        idx = 2
        b_ref = None
        r_ref = None
        if has_bias:
            b_ref = refs[idx]; idx += 1
        if has_residual:
            r_ref = refs[idx]; idx += 1
        o_ref, acc_ref = refs[idx], refs[idx + 1]

        k = pl.program_id(2)

        @pl.when(k == 0)
        def _init():
            acc_ref[...] = jnp.zeros_like(acc_ref)

        acc_ref[...] += jnp.dot(x_ref[...].astype(jnp.bfloat16), w_ref[...],
                                preferred_element_type=jnp.float32)

        @pl.when(k == pl.num_programs(2) - 1)
        def _finalize():
            y = acc_ref[...]
            if has_bias:
                y = y + b_ref[...]
            if activation == 'gelu_tanh':
                y = _gelu_tanh(y)
            if has_residual:
                y = y + r_ref[...].astype(jnp.float32)
            o_ref[...] = y.astype(o_ref.dtype)

    return kernel


def _make_ln_linear_kernel(has_bias, activation):
    """LayerNorm fused into the matmul prologue (K = full feature dim)."""

    def kernel(*refs):
        x_ref, g_ref, b_ref, w_ref = refs[0], refs[1], refs[2], refs[3]
        idx = 4
        bias_ref = None
        if has_bias:
            bias_ref = refs[idx]; idx += 1
        o_ref = refs[idx]

        x = x_ref[...].astype(jnp.float32)
        mu = jnp.mean(x, axis=-1, keepdims=True)
        var = jnp.mean(jnp.square(x - mu), axis=-1, keepdims=True)
        xn = (x - mu) * jax.lax.rsqrt(var + 1e-5) * g_ref[...] + b_ref[...]
        y = jnp.dot(xn.astype(jnp.bfloat16), w_ref[...],
                    preferred_element_type=jnp.float32)
        if has_bias:
            y = y + bias_ref[...]
        if activation == 'gelu_tanh':
            y = _gelu_tanh(y)
        o_ref[...] = y.astype(o_ref.dtype)

    return kernel


def _layernorm_kernel(x_ref, g_ref, b_ref, o_ref):
    x = x_ref[...].astype(jnp.float32)
    mu = jnp.mean(x, axis=-1, keepdims=True)
    var = jnp.mean(jnp.square(x - mu), axis=-1, keepdims=True)
    o_ref[...] = ((x - mu) * jax.lax.rsqrt(var + 1e-5) * g_ref[...]
                  + b_ref[...]).astype(o_ref.dtype)


def _attention_kernel(q_ref, k_ref, v_ref, o_ref, att1_ref, *, scale):
    # One (batch, head, q-block) step.  Refs are squeezed 2-D tiles:
    #   q_ref: (tq, hd), k_ref/v_ref: (Tp, hd), o_ref: (tq, hd), att1_ref: (tq, Tp)
    qi = pl.program_id(2)
    tq, Tp = att1_ref.shape

    # Fold the 1/sqrt(d) scale into q (tq*hd mul) instead of the (tq,Tp) scores.
    q = (q_ref[...].astype(jnp.float32) * scale).astype(jnp.bfloat16)
    s = jax.lax.dot_general(q, k_ref[...], (((1,), (1,)), ((), ())),
                            preferred_element_type=jnp.float32)        # (tq, Tp)
    att1_ref[...] = s.astype(att1_ref.dtype)   # raw scaled scores (pre-mask/softmax)

    row = qi * tq + jax.lax.broadcasted_iota(jnp.int32, (tq, Tp), 0)
    col = jax.lax.broadcasted_iota(jnp.int32, (tq, Tp), 1)
    s = jnp.where(col <= row, s, -jnp.inf)
    p = jnp.exp(s - jnp.max(s, axis=-1, keepdims=True))
    p = p * pl.reciprocal(jnp.sum(p, axis=-1, keepdims=True), approx=True)
    o = jnp.dot(p.astype(jnp.bfloat16), v_ref[...],
                preferred_element_type=jnp.float32)
    o_ref[...] = o.astype(o_ref.dtype)
    # TODO(synk): for very long T, go flash-style over K/V blocks (online softmax)
    # so K/V and the (tq, T) score row no longer scale with full T.


# ----------------------------- kernel wrappers ------------------------------

def pallas_linear(x, w, b=None, residual=None, activation=None,
                  out_dtype=jnp.float32, tm=512, tn=512, tk=2048, n_out=None):
    """y = act(x @ w + b) [+ residual].

    x: (M, K) any float dtype (cast to bf16 in-kernel for the MXU).
    w: (Kp, Np) pre-padded bf16; b: (1, Np) pre-padded f32; residual: (M, Np) f32.
    """
    M, K = x.shape
    Kp, Np = w.shape
    assert K <= Kp

    tm = min(tm, _round_up(M, 8))
    Mp = _round_up(M, tm)
    tk = _pick_tile(Kp, tk)
    tn = _pick_tile(Np, tn)

    xp = x
    if K < Kp:
        xp = jnp.pad(xp, ((0, 0), (0, Kp - K)))
    xp = _pad_rows(xp, Mp)

    inputs = [xp, w]
    in_specs = [pl.BlockSpec((tm, tk), lambda i, j, k: (i, k)),
                pl.BlockSpec((tk, tn), lambda i, j, k: (k, j))]
    # TODO(synk): on v5e consider pipeline_mode=pl.Buffered(3) for the weight spec.
    if b is not None:
        inputs.append(b)
        in_specs.append(pl.BlockSpec((1, tn), lambda i, j, k: (0, j)))
    if residual is not None:
        assert residual.shape[1] == Np
        inputs.append(_pad_rows(residual, Mp))
        in_specs.append(pl.BlockSpec((tm, tn), lambda i, j, k: (i, j)))

    out = pl.pallas_call(
        _make_linear_kernel(b is not None, residual is not None, activation),
        out_shape=jax.ShapeDtypeStruct((Mp, Np), out_dtype),
        grid=(Mp // tm, Np // tn, Kp // tk),
        in_specs=in_specs,
        out_specs=pl.BlockSpec((tm, tn), lambda i, j, k: (i, j)),
        scratch_shapes=[pltpu.VMEM((tm, tn), jnp.float32)],
        compiler_params=pltpu.CompilerParams(
            dimension_semantics=("parallel", "parallel", "arbitrary"),
            vmem_limit_bytes=_VMEM_LIMIT),
    )(*inputs)

    out = out[:M]
    if n_out is not None and n_out != Np:
        out = out[:, :n_out]
    return out


def pallas_ln_linear(x, g, b, w, bias=None, activation=None,
                     out_dtype=jnp.bfloat16, tm=512, tn=512, n_out=None):
    """y = act(LayerNorm(x) @ w + bias), LN fused into the matmul prologue.

    Requires the feature dim K (= n_embd) to be un-padded, i.e. K % 128 == 0,
    so the in-kernel mean/var are exact.  x: (M, K) f32; w: (K, Np) bf16.
    """
    M, K = x.shape
    Kw, Np = w.shape
    assert K == Kw, "fused LN needs un-padded feature dim (n_embd % 128 == 0)"

    tm = min(tm, _round_up(M, 8))
    Mp = _round_up(M, tm)
    tn = _pick_tile(Np, tn)
    xp = _pad_rows(x, Mp)

    inputs = [xp, g, b, w]
    in_specs = [pl.BlockSpec((tm, K), lambda i, j: (i, 0)),
                pl.BlockSpec((1, K), lambda i, j: (0, 0)),
                pl.BlockSpec((1, K), lambda i, j: (0, 0)),
                pl.BlockSpec((K, tn), lambda i, j: (0, j))]
    if bias is not None:
        inputs.append(bias)
        in_specs.append(pl.BlockSpec((1, tn), lambda i, j: (0, j)))

    out = pl.pallas_call(
        _make_ln_linear_kernel(bias is not None, activation),
        out_shape=jax.ShapeDtypeStruct((Mp, Np), out_dtype),
        grid=(Mp // tm, Np // tn),
        in_specs=in_specs,
        out_specs=pl.BlockSpec((tm, tn), lambda i, j: (i, j)),
        compiler_params=pltpu.CompilerParams(
            dimension_semantics=("parallel", "parallel"),
            vmem_limit_bytes=_VMEM_LIMIT),
    )(*inputs)

    out = out[:M]
    if n_out is not None and n_out != Np:
        out = out[:, :n_out]
    return out


def pallas_layernorm(x, g, b, out_dtype=jnp.float32, tm=512):
    """Standalone row-wise LayerNorm (eps=1e-5); used only for the visual prefix."""
    M, C = x.shape
    tm = min(tm, _round_up(M, 8))
    Mp = _round_up(M, tm)
    xp = _pad_rows(x, Mp)
    out = pl.pallas_call(
        _layernorm_kernel,
        out_shape=jax.ShapeDtypeStruct((Mp, C), out_dtype),
        grid=(Mp // tm,),
        in_specs=[pl.BlockSpec((tm, C), lambda i: (i, 0)),
                  pl.BlockSpec((1, C), lambda i: (0, 0)),
                  pl.BlockSpec((1, C), lambda i: (0, 0))],
        out_specs=pl.BlockSpec((tm, C), lambda i: (i, 0)),
        compiler_params=pltpu.CompilerParams(
            dimension_semantics=("parallel",),
            vmem_limit_bytes=_VMEM_LIMIT),
    )(xp, g, b)
    return out[:M]


def pallas_attention(qkv, B, Tp, H, hd, att_dtype=jnp.float32):
    """Causal self-attention reading the packed QKV activation directly.

    qkv: (B*Tp, 3*H*hd) bf16 laid out [q | k | v], each head-major — exactly the
    c_attn output layout, so no head split/merge transposes are needed.
    Returns out: (B, Tp, H*hd) bf16 and att1: (B, H, Tp, Tp) (raw scaled scores).
    """
    C = H * hd
    assert qkv.shape == (B * Tp, 3 * C)
    assert hd % 128 == 0, "head_dim must be a multiple of 128 for lane-aligned head slicing"
    qkv3 = qkv.reshape(B, Tp, 3 * C)          # free reshape, no transpose

    tq = min(256, Tp)
    assert Tp % tq == 0
    nq = Tp // tq
    scale = 1.0 / math.sqrt(hd)
    kern = functools.partial(_attention_kernel, scale=scale)

    out, att1 = pl.pallas_call(
        kern,
        out_shape=(jax.ShapeDtypeStruct((B, Tp, C), jnp.bfloat16),
                   jax.ShapeDtypeStruct((B, H, Tp, Tp), att_dtype)),
        grid=(B, H, nq),
        in_specs=[pl.BlockSpec((None, tq, hd), lambda b, h, qi: (b, qi, h)),
                  pl.BlockSpec((None, Tp, hd), lambda b, h, qi: (b, 0, H + h)),
                  pl.BlockSpec((None, Tp, hd), lambda b, h, qi: (b, 0, 2 * H + h))],
        out_specs=(pl.BlockSpec((None, tq, hd), lambda b, h, qi: (b, qi, h)),
                   pl.BlockSpec((None, None, tq, Tp), lambda b, h, qi: (b, h, qi, 0))),
        compiler_params=pltpu.CompilerParams(
            dimension_semantics=("parallel", "parallel", "arbitrary"),
            vmem_limit_bytes=_VMEM_LIMIT),
    )(qkv3, qkv3, qkv3)
    return out, att1


# ----------------------------- model forward --------------------------------

def modified_decoder_forward(params, tokens, image_features, cfg):
    B, Tt = tokens.shape
    C = cfg['n_embd']
    H = cfg['n_head']
    hd = C // H
    V = cfg['vocab_size']

    # visual prefix: Linear(1408->1088) -> Linear(1088->C) -> LayerNorm
    Bi, Ti, Fi = image_features.shape
    vf = image_features.reshape(Bi * Ti, Fi).astype(jnp.float32)
    ve = pallas_linear(vf, params['vp1_w'], params['vp1_b'],
                       out_dtype=jnp.bfloat16)          # keep padded cols (zeros)
    ve = pallas_linear(ve, params['vp2_w'], params['vp2_b'],
                       out_dtype=jnp.float32, n_out=C)
    ve = pallas_layernorm(ve, params['ln_g'], params['ln_b'])
    ve = ve.reshape(Bi, Ti, C)

    # TODO(synk): token/positional embedding gathers + concat stay in XLA (glue).
    tok = params['wte'][tokens]
    x = jnp.concatenate([ve, tok], axis=1)
    T = min(x.shape[1], cfg['block_size'])               # torch.narrow
    x = x[:, :T]

    # Pad the sequence once to a q-tile friendly length; padded rows are finite
    # (causal mask hides padded keys) and are sliced off at the end.
    Tp8 = _round_up(T, 8)
    Tp = Tp8 if Tp8 <= 256 else _round_up(T, 256)
    pos = jnp.pad(params['wpe'][:T], ((0, Tp - T), (0, 0)))
    x = jnp.pad(x, ((0, 0), (0, Tp - T), (0, 0))) + pos[None]
    x2d = x.reshape(B * Tp, C)                            # f32 residual stream

    attn_list = []
    for lp in params['blocks']:
        # ln_1 fused into c_attn; QKV stays bf16 and is consumed head-indexed.
        qkv = pallas_ln_linear(x2d, lp['ln1_g'], lp['ln1_b'],
                               lp['attn_w'], lp['attn_b'],
                               out_dtype=jnp.bfloat16)
        attn_out, att1 = pallas_attention(qkv, B, Tp, H, hd)
        attn_list.append(att1[:, :, :T, :T])

        # c_proj with the residual add fused into the matmul epilogue.
        x2d = pallas_linear(attn_out.reshape(B * Tp, C),
                            lp['cproj_w'], lp['cproj_b'],
                            residual=x2d, out_dtype=jnp.float32)

        # ln_2 fused into c_fc (+ tanh-GELU); mlp c_proj with fused residual.
        hmid = pallas_ln_linear(x2d, lp['ln2_g'], lp['ln2_b'],
                                lp['fc_w'], lp['fc_b'],
                                activation='gelu_tanh', out_dtype=jnp.bfloat16)
        x2d = pallas_linear(hmid, lp['mproj_w'], lp['mproj_b'],
                            residual=x2d, out_dtype=jnp.float32)

    # ln_f fused into lm_head (no bias, no zeros add).
    logits = pallas_ln_linear(x2d, params['lnf_g'], params['lnf_b'],
                              params['lm_w'], None,
                              out_dtype=jnp.float32, n_out=V)
    logits = logits.reshape(B, Tp, V)[:, :T]
    return logits, attn_list


# ----------------------------- parameter setup -------------------------------

def init_params(key, cfg):
    C = cfg['n_embd']
    V = cfg['vocab_size']
    L = cfg['n_layer']
    BS = cfg['block_size']
    r = 16
    scaling = 1.0 / r   # lora default: alpha=1, scaling = alpha / r

    keys = iter(jax.random.split(key, 256))

    def nrm(shape, std=0.02):
        return std * jax.random.normal(next(keys), shape, jnp.float32)

    def ones_g():
        return jnp.ones((1, C), jnp.float32)

    def zeros_b():
        return jnp.zeros((1, C), jnp.float32)

    wte = nrm((V, C))                                  # tied embedding / lm_head base
    lmA = nrm((r, C))
    lmB = nrm((V, r))
    lm_w = (wte + scaling * (lmB @ lmA)).T             # stored (C, V) for x @ W

    params = dict(
        wte=wte,                                       # f32: embedding gather
        wpe=nrm((BS, C)),
        vp1_w=_prep_w(nrm((1408, 1088))), vp1_b=_prep_b(nrm((1088,))),
        vp2_w=_prep_w(nrm((1088, C))), vp2_b=_prep_b(nrm((C,))),
        ln_g=ones_g(), ln_b=zeros_b(),
        lnf_g=ones_g(), lnf_b=zeros_b(),
        lm_w=_prep_w(lm_w),
        blocks=[],
    )

    for _ in range(L):
        fc_base = nrm((C, 4 * C))
        fcA = nrm((r, C))
        fcB = nrm((4 * C, r))
        pj_base = nrm((4 * C, C))
        pjA = nrm((r, 4 * C))
        pjB = nrm((C, r))
        params['blocks'].append(dict(
            ln1_g=ones_g(), ln1_b=zeros_b(),
            ln2_g=ones_g(), ln2_b=zeros_b(),
            # ln_3 is unused in Block.forward -> omitted
            attn_w=_prep_w(nrm((C, 3 * C))), attn_b=_prep_b(nrm((3 * C,))),
            cproj_w=_prep_w(nrm((C, C))), cproj_b=_prep_b(nrm((C,))),
            fc_w=_prep_w(fc_base + scaling * (fcB @ fcA).T),
            fc_b=_prep_b(nrm((4 * C,))),
            mproj_w=_prep_w(pj_base + scaling * (pjB @ pjA).T),
            mproj_b=_prep_b(nrm((C,))),
        ))
    return params


# ----------------------------------- main ------------------------------------

if __name__ == "__main__":
    # Small but lane-friendly config: head_dim = 256/2 = 128 (per perf guidance).
    cfg = dict(n_embd=256, n_head=2, n_layer=2, block_size=32, vocab_size=512)

    key = jax.random.PRNGKey(0)
    kp, kt, ki = jax.random.split(key, 3)

    params = init_params(kp, cfg)

    B, Tt, Ti = 2, 8, 4   # 4 visual tokens + 8 text tokens = 12 <= block_size 32
    tokens = jax.random.randint(kt, (B, Tt), 0, cfg['vocab_size'], dtype=jnp.int32)
    image_features = jax.random.normal(ki, (B, Ti, 1408), jnp.float32)

    logits, attn_list = modified_decoder_forward(params, tokens, image_features, cfg)

    jax.block_until_ready(logits)
    for a in attn_list:
        jax.block_until_ready(a)

    assert logits.shape == (B, Ti + Tt, cfg['vocab_size'])
    assert len(attn_list) == cfg['n_layer']
    assert attn_list[0].shape == (B, cfg['n_head'], Ti + Tt, Ti + Tt)
    assert bool(jnp.isfinite(logits).all())

    print("KERNEL_OK")
</pallas_src>

<mosaic_0001>
module attributes {stable_mosaic.version = 11 : i64} {
  func.func @kernel(%arg0: i32, %arg1: i32, %arg2: i32, %arg3: memref<8x1408xf32, #tpu.memory_space<vmem>>, %arg4: memref<1408x384xbf16, #tpu.memory_space<vmem>>, %arg5: memref<1x384xf32, #tpu.memory_space<vmem>>, %arg6: memref<8x384xbf16, #tpu.memory_space<vmem>>, %arg7: memref<8x384xf32, #tpu.memory_space<vmem>>) attributes {dimension_semantics = [#tpu.dimension_semantics<parallel>, #tpu.dimension_semantics<parallel>, #tpu.dimension_semantics<arbitrary>], iteration_bounds = array<i64: 1, 3, 1>, scalar_prefetch = 0 : i64, scratch_operands = 1 : i64, tpu.core_type = #tpu.core_type<tc>, window_params = [{transform_indices = @transform_0, window_bounds = array<i64: 8, 1408>}, {transform_indices = @transform_1, window_bounds = array<i64: 1408, 384>}, {transform_indices = @transform_2, window_bounds = array<i64: 1, 384>}, {transform_indices = @transform_3, window_bounds = array<i64: 8, 384>}]} {
    %c0_i32 = arith.constant 0 : i32
    %0 = arith.cmpi eq, %arg2, %c0_i32 : i32
    %1 = arith.extui %0 : i1 to i32
    %c0_i32_0 = arith.constant 0 : i32
    %2 = arith.cmpi ne, %1, %c0_i32_0 : i32
    scf.if %2 {
      %cst_10 = arith.constant 0.000000e+00 : f32
      %13 = vector.broadcast %cst_10 : f32 to vector<8x384xf32>
      %c0_11 = arith.constant 0 : index
      %c0_12 = arith.constant 0 : index
      %14 = vector.load %arg7[%c0_11, %c0_12] : memref<8x384xf32, #tpu.memory_space<vmem>>, vector<8x384xf32>
      tpu.vector_store %arg7[%c0_11, %c0_12], %13 {strides = array<i32>} : memref<8x384xf32, #tpu.memory_space<vmem>>, vector<8x384xf32>,
    } else {
    }
    %c0 = arith.constant 0 : index
    %c0_1 = arith.constant 0 : index
    %3 = vector.load %arg7[%c0, %c0_1] : memref<8x384xf32, #tpu.memory_space<vmem>>, vector<8x384xf32>
    %c0_2 = arith.constant 0 : index
    %c0_3 = arith.constant 0 : index
    %4 = vector.load %arg3[%c0_2, %c0_3] : memref<8x1408xf32, #tpu.memory_space<vmem>>, vector<8x1408xf32>
    %5 = arith.truncf %4 : vector<8x1408xf32> to vector<8x1408xbf16>
    %c0_4 = arith.constant 0 : index
    %c0_5 = arith.constant 0 : index
    %6 = vector.load %arg4[%c0_4, %c0_5] : memref<1408x384xbf16, #tpu.memory_space<vmem>>, vector<1408x384xbf16>
    %cst = arith.constant dense<0.000000e+00> : vector<8x384xf32>
    %7 = tpu.matmul %5, %6, %cst {dimension_numbers = #tpu.dot_dimension_numbers<[1], [0], [0], [1], [0, 0, 1, 1], [], []>} : vector<8x1408xbf16>, vector<1408x384xbf16>, vector<8x384xf32> -> vector<8x384xf32>
    %8 = arith.addf %3, %7 : vector<8x384xf32>
    %c0_6 = arith.constant 0 : index
    %c0_7 = arith.constant 0 : index
    %9 = vector.load %arg7[%c0_6, %c0_7] : memref<8x384xf32, #tpu.memory_space<vmem>>, vector<8x384xf32>
    tpu.vector_store %arg7[%c0_6, %c0_7], %8 {strides = array<i32>} : memref<8x384xf32, #tpu.memory_space<vmem>>, vector<8x384xf32>,
    %c0_i32_8 = arith.constant 0 : i32
    %10 = arith.cmpi eq, %arg2, %c0_i32_8 : i32
    %11 = arith.extui %10 : i1 to i32
    %c0_i32_9 = arith.constant 0 : i32
    %12 = arith.cmpi ne, %11, %c0_i32_9 : i32
    scf.if %12 {
      %c0_10 = arith.constant 0 : index
      %c0_11 = arith.constant 0 : index
      %13 = vector.load %arg7[%c0_10, %c0_11] : memref<8x384xf32, #tpu.memory_space<vmem>>, vector<8x384xf32>
      %c0_12 = arith.constant 0 : index
      %c0_13 = arith.constant 0 : index
      %14 = vector.load %arg5[%c0_12, %c0_13] : memref<1x384xf32, #tpu.memory_space<vmem>>, vector<1x384xf32>
      %15 = vector.broadcast %14 : vector<1x384xf32> to vector<8x384xf32>
      %16 = arith.addf %13, %15 : vector<8x384xf32>
      %17 = arith.truncf %16 : vector<8x384xf32> to vector<8x384xbf16>
      %c0_14 = arith.constant 0 : index
      %c0_15 = arith.constant 0 : index
      %18 = vector.load %arg6[%c0_14, %c0_15] : memref<8x384xbf16, #tpu.memory_space<vmem>>, vector<8x384xbf16>
      tpu.vector_store %arg6[%c0_14, %c0_15], %17 {strides = array<i32>} : memref<8x384xbf16, #tpu.memory_space<vmem>>, vector<8x384xbf16>,
    } else {
    }
    return
  }
  func.func @transform_0(%arg0: i32, %arg1: i32, %arg2: i32) -> (i32, i32) {
    %c0_i32 = arith.constant 0 : i32
    return %arg0, %arg2 : i32, i32
  }
  func.func @transform_1(%arg0: i32, %arg1: i32, %arg2: i32) -> (i32, i32) {
    %c0_i32 = arith.constant 0 : i32
    return %arg2, %arg1 : i32, i32
  }
  func.func @transform_2(%arg0: i32, %arg1: i32, %arg2: i32) -> (i32, i32) {
    %c0_i32 = arith.constant 0 : i32
    %c0_i32_0 = arith.constant 0 : i32
    return %c0_i32, %arg1 : i32, i32
  }
  func.func @transform_3(%arg0: i32, %arg1: i32, %arg2: i32) -> (i32, i32) {
    %c0_i32 = arith.constant 0 : i32
    return %arg0, %arg1 : i32, i32
  }
}

</mosaic_0001>

<bundles_post_ra>
// kernel: tpu_custom_call.1
= control target key start
LH: loop header
LB: loop body
LE: loop exit
PB: predicated region body
PF: predicated region fallthrough
CT: control target
= control target key end

     0   :  { %8 = vsyncpa [#allocation4], 0  ;;  %s4303_s0 = inlined_call_operand.hbm [shape: f32[8,1408], index: 0, kind: input, shape index: {}]   ;;  %s4304_s1 = inlined_call_operand.hbm [shape: bf16[1408,1152], index: 1, kind: input, shape index: {}]   ;;  %s4305_s2 = inlined_call_operand.hbm [shape: f32[1,1152], index: 2, kind: input, shape index: {}]   ;;  %s4306_s3 = inlined_call_operand.hbm [shape: bf16[8,1152], index: 3, kind: output, shape index: {}]  }
   0x1   :  { %9 = vsyncpa [#allocation7], 0 }
   0x2   :  { %11 = vsyncpa [#allocation7 + $0x1], 0 }
   0x3   :  { %12 = vsyncpa [#allocation5], 0 }
   0x4   :  { %14 = vsyncpa [#allocation5 + $0x1], 0  ;;  %s3808_s12 = smov 0   ;;  %s3810_s13 = smov 0  }
   0x5   :  { %s3812_s14 = smov 0   ;;  %s3814_s15 = smov 0  }
   0x6   :  { %s3816_s16 = smov 0   ;;  %s3818_s17 = smov 0  }
   0x7 LB: > { %s35_s18 = sadd.s32 1, %s3772_s16  ;;  %s76_s19 = sadd.s32 1, %s3764_s14  ;;  %s3776_s17 = sphi %s3818_s17, %s20_s17   ;;  %s3772_s16 = sphi %s3816_s16, %s4328_s16   ;;  %s3768_s15 = sphi %s3814_s15, %s4327_s15   ;;  %s3764_s14 = sphi %s3812_s14, %s4326_s14   ;;  %s3760_s13 = sphi %s3810_s13, %s4325_s13   ;;  %s3756_s12 = sphi %s3808_s12, %s4324_s12  }
   0x8   : > { %p37_p0 = scmp.ge.s32.totalorder %s35_s18, 3  ;;  %p83_p1 = scmp.ne.s32.totalorder %s3764_s14, %s3760_s13 }
   0x9   : > { %p84_p2 = scmp.eq.s32.totalorder %s3776_s17, 0  ;;  %p3200_p4 = scmp.lt.s32.totalorder %s3776_s17, 3 }
   0xa   : > { %s4330_s18 = smov (%p37_p0, %s35_s18), 0  ;;  %s183_s21 = sand.u32 1, %s3776_s17  }
   0xb   : > { %p85_p3 = por %p84_p2, %p83_p1  ;;  %s72_s20 = ssub.s32 %s3772_s16, %s4330_s18 }
   0xc   : > { %p74_p5 = scmp.eq.s32.totalorder %s72_s20, 0  ;;  %s185_s22 = sand.u32 1, %s3764_s14  }
   0xd   : > { %s3025_s23 = smul.u32 192, %s3772_s16  ;;  %p3862_p6 = pnand %p3200_p4, %p85_p3 }
   0xe   : > { %s3855_s24 = scalar_select %p74_p5, %s3764_s14, %s76_s19  }
   0xf   : > { %s3169_s25 = smul.u32 2112, %s185_s22  ;;  %s196_s28 = scalar_lea.hbm %s4304_s1, %s3025_s23 }
  0x10   : > { %s3866_s5 = scalar_lea.sflag [#allocation7], %s183_s21  ;;  %p4307_p7 = pneg %p3862_p6 }
  0x11   : > { %s187_s30 = scalar_lea.vmem [#allocation6], %s3169_s25  ;;  %s3778_s7 = smov [#allocation6]  }
  0x12   : > { %s197_s4 = sshll.u32 %s187_s30, 4  ;;  %s3628_s8 = sshll.u32 %s3778_s7, 4  ;;  %s198_s4 = int_to_ptr.vmem [resolvable:$true] %s197_s4  ;;  %s3629_s8 = int_to_ptr.vmem [resolvable:$false] %s3628_s8 }
  0x13   : > { %s3623_s6 = scalar_lea.vmem %s198_s4, 33792  ;;  %s3630_s9 = scalar_lea.vmem %s3629_s8, 67584 }
  0x14   : > { %p3624_p8 = scmp.ne.s32.totalorder %s198_s4, %s3623_s6  ;;  %p3631_p11 = scmp.lt.s32.totalorder %s198_s4, %s3629_s8 }
  0x15   : > { %p3632_p12 = scmp.lt.s32.totalorder %s3630_s9, %s3623_s6 }
  0x16   : > { %p3626_p9 = pnand %p3624_p8, %p4307_p7 }
  0x17   : > { %p3633_p13 = por %p3632_p12, %p3631_p11 }
  0x18   : > { %p3627_p10 = pneg %p3626_p9 }
  0x1a   : > { %p3634_p0 = pnand %p3633_p13, %p3627_p10 }
  0x1c   : > { %3637 = shalt.err (!%p3634_p0)
}
  0x1d   : > { %s3779_s10 = smov 576   ;;  %s3780_s11 = smov 192  }
  0x1e   : > { %s3781_s19 = smov 12   ;;  %s3877_s20 = sadd.s32 4294967295, %s3776_s17  }
  0x1f   : > { %3191 = dma.hbm_to_vmem [thread:$0]  (!%p3862_p6), %s196_s28, 33792, %s198_s4, %s3866_s5, %s3779_s10, %s3780_s11, %s3781_s19  }
  0x20   : > { %s2748_s21 = sadd.s32 4294967294, %s3776_s17   ;;  %p89_p2 = scmp.ne.s32.totalorder %s3760_s13, %s3756_s12 }
  0x21   : > { %p4309_p3 = scmp.eq.s32.totalorder %s3877_s20, 0  ;;  %p141_p4 = scmp.eq.s32.totalorder %s3877_s20, 2 }
  0x22   : > { %p147_p5 = scmp.eq.s32.totalorder %s2748_s21, 2  ;;  %p2749_p9 = scmp.ge.s32.totalorder %s3776_s17, 1 }
  0x23   : > { %p3886_p8 = por %p4309_p3, %p89_p2  ;;  %p3894_p10 = por %p141_p4, %p83_p1 }
  0x24   : > { %p3898_p11 = por %p147_p5, %p89_p2  ;;  %p154_p12 = scmp.lt.s32.totalorder %s3776_s17, 4 }
  0x25   : > { %s4313_s23 = scalar_select %p3886_p8, 1, 0 }
  0x26   : > { %s4314_s25 = scalar_select %p3894_p10, 1, 0 }
  0x27   : > { %s4315_s26 = scalar_select %p3898_p11, 1, 0 }
  0x28   : > { %s3170_s27 = smul.u32 3, %s185_s22  ;;  %p3905_p13 = pnand %p2749_p9, %p154_p12 }
  0x29   : > { %s3782_s30 = smov [#allocation3]   ;;  %s3026_s6 = smul.u32 48, %s3772_s16 }
  0x2a   : > { %s4316_s28 = scalar_select %p3905_p13, 1, 0 }
  0x2b   : > { %s172_s4 = sshll.u32 %s3782_s30, 4  ;;  %p3184_p0 = pneg %p3905_p13  ;;  %s173_s4 = int_to_ptr.vmem [resolvable:$true] %s172_s4 }
  0x2c   : > { %s211_s7 = scalar_lea.vmem [#allocation8], %s3170_s27  ;;  %s217_s11 = scalar_lea.hbm %s4305_s2, %s3026_s6 }
  0x2d   : > { %s219_s8 = sshll.u32 %s211_s7, 4  ;;  %p3185_p1 = pnand %p3184_p0, %p4309_p3  ;;  %s220_s8 = int_to_ptr.vmem [resolvable:$true] %s219_s8 }
  0x2e   : > { %s3649_s22 = scalar_lea.vmem %s173_s4, 1408  ;;  %p3657_p12 = scmp.lt.s32.totalorder %s173_s4, %s173_s4 }
  0x2f   : > { %p3640_p2 = pneg %p3185_p1  ;;  %p3650_p4 = scmp.ne.s32.totalorder %s173_s4, %s3649_s22 }
  0x30   : > { %p3658_p7 = scmp.lt.s32.totalorder %s3649_s22, %s3649_s22 }
  0x31   : > { %p3652_p5 = pnand %p3650_p4, %p3640_p2 }
  0x32   : > { %p3659_p11 = por %p3658_p7, %p3657_p12 }
  0x33   : > { %p3653_p9 = pneg %p3652_p5 }
  0x35   : > { %p3660_p10 = pnand %p3659_p11, %p3653_p9 }
  0x37   : > { %3663 = shalt.err (!%p3660_p10)
}
  0x38   : > { %3187 = dma.hbm_to_vmem [thread:$0]  (!%p3185_p1), %s4303_s0, 1408, %s173_s4, [#allocation4]  }
  0x39   : > { %s3677_s27 = scalar_lea.vmem %s220_s8, 48  ;;  %p4317_p3 = pneg %p3862_p6 }
  0x3a   : > { %p3678_p0 = scmp.ne.s32.totalorder %s220_s8, %s3677_s27  ;;  %s3783_s30 = smov [#allocation8]  }
  0x3b   : > { %s3682_s6 = sshll.u32 %s3783_s30, 4  ;;  %s3683_s6 = int_to_ptr.vmem [resolvable:$false] %s3682_s6 }
  0x3c   : > { %p3680_p8 = pnand %p3678_p0, %p4317_p3  ;;  %s3684_s7 = scalar_lea.vmem %s3683_s6, 96 }
  0x3d   : > { %p3685_p2 = scmp.lt.s32.totalorder %s220_s8, %s3683_s6  ;;  %p3686_p4 = scmp.lt.s32.totalorder %s3684_s7, %s3677_s27 }
  0x3e   : > { %p3681_p13 = pneg %p3680_p8 }
  0x3f   : > { %p3687_p7 = por %p3686_p4, %p3685_p2 }
  0x41   : > { %p3688_p11 = pnand %p3687_p7, %p3681_p13 }
  0x43   : > { %3691 = shalt.err (!%p3688_p11)
}
  0x44   : > { %3194 = dma.hbm_to_vmem [thread:$0]  (!%p3862_p6), %s217_s11, 48, %s220_s8, %s3866_s5  }
  0x45   : > { %p4318_p10 = scmp.ne.s32.totalorder %s4316_s28, 0 }
  0x46   : > { %p4319_p1 = scmp.eq.s32.totalorder (!%p4318_p10), %s3877_s20, 0 }
  0x47   : > { %228 = sbr.rel (%p4318_p10) target bundleno = 583 (0x247), region = 32 }
  0x4c   : > { %3743 = dma.done.wait (%p4319_p1), [#allocation4], 1408   ;;  %p4320_p3 = pmov %p4319_p1 }
  0x4d   : > { %s234_s4 = sand.u32 1, %s3877_s20   ;;  %s3934_s9 = sand.u32 1, %s3760_s13  }
  0x4e   : > { %3745 = vsyncadd (%p4320_p3), [#allocation4], 4294965888  ;;  %s3171_s10 = smul.u32 2112, %s3934_s9  ;;  %s235_s29 = scalar_lea.sflag [#allocation7], %s234_s4 }
  0x4f   : > { %p4321_p6 = scmp.ne.s32.totalorder %s4313_s23, 0 }
  0x50   : > { %s3937_s22 = scalar_lea.vmem [#allocation6], %s3171_s10 }
  0x51   : > { %3747 = dma.done.wait (%p4321_p6), %s235_s29, 33840  }
  0x52   : > { %3749 = vsyncadd (%p4321_p6), %s235_s29, 4294933456  ;;  %v3258_v0 = vld [vmem:[%s3937_s22 + $0xac] ss:$12 sps:$4 sm:$0xff]   ;;  %v3262_v2 = vld [vmem:[%s3937_s22 + $0xa8] ss:$12 sps:$4 sm:$0xff]   ;;  %vm3786_vm0 = vmmov 0  }
  0x53   : > { %v3260_v1 = vld [vmem:[%s3937_s22 + $0x22c] ss:$12 sps:$4 sm:$0xff]   ;;  %2073 = vmatprep.subr.bf16.mxu0 %v3258_v0  ;;  %v3263_v3 = vld [vmem:[%s3937_s22 + $0x228] ss:$12 sps:$4 sm:$0xff]   ;;  %v3268_v6 = vld [vmem:[%s3937_s22 + $0x90] ss:$12 sps:$4 sm:$0xff]  }
  0x54   : > { %2114 = vmatprep.subr.bf16.mxu1 %v3260_v1  ;;  %v3264_v4 = vld [vmem:[%s3937_s22 + $0x94] ss:$12 sps:$4 sm:$0xff]   ;;  %2074 = vmatpush1.bf16.msra.mxu0 %v3262_v2  ;;  %v3269_v7 = vld [vmem:[%s3937_s22 + $0x210] ss:$12 sps:$4 sm:$0xff]   ;;  %v3274_v10 = vld [vmem:[%s3937_s22 + $0x78] ss:$12 sps:$4 sm:$0xff]  }
  0x55   : > { %2115 = vmatpush1.bf16.msra.mxu1 %v3263_v3  ;;  %v3266_v5 = vld [vmem:[%s3937_s22 + $0x214] ss:$12 sps:$4 sm:$0xff]   ;;  %2075 = vmatprep.subr.bf16.mxu0 %v3264_v4  ;;  %v3270_v8 = vld [vmem:[%s3937_s22 + $0x7c] ss:$12 sps:$4 sm:$0xff]   ;;  %v3275_v11 = vld [vmem:[%s3937_s22 + $0x1f8] ss:$12 sps:$4 sm:$0xff]  }
  0x56   : > { %2116 = vmatprep.subr.bf16.mxu1 %v3266_v5  ;;  %v3272_v9 = vld [vmem:[%s3937_s22 + $0x1fc] ss:$12 sps:$4 sm:$0xff]   ;;  %v3276_v12 = vld [vmem:[%s3937_s22 + $0x64] ss:$12 sps:$4 sm:$0xff]   ;;  %v3280_v14 = vld [vmem:[%s3937_s22 + $0x60] ss:$12 sps:$4 sm:$0xff]  }
  0x57   : > { %v3278_v13 = vld [vmem:[%s3937_s22 + $0x1e4] ss:$12 sps:$4 sm:$0xff]   ;;  %v3281_v15 = vld [vmem:[%s3937_s22 + $0x1e0] ss:$12 sps:$4 sm:$0xff]   ;;  %v3286_v18 = vld [vmem:[%s3937_s22 + $0x48] ss:$12 sps:$4 sm:$0xff]  }
  0x58   : > { %2076 = vmatpush1.bf16.msra.mxu0 %v3268_v6  ;;  %v3282_v16 = vld [vmem:[%s3937_s22 + $0x4c] ss:$12 sps:$4 sm:$0xff]   ;;  %v3287_v19 = vld [vmem:[%s3937_s22 + $0x1c8] ss:$12 sps:$4 sm:$0xff]   ;;  %v3292_v22 = vld [vmem:[%s3937_s22 + $0x30] ss:$12 sps:$4 sm:$0xff]  }
  0x59   : > { %2117 = vmatpush1.bf16.msra.mxu1 %v3269_v7  ;;  %2077 = vmatprep.subr.bf16.mxu0 %v3270_v8  ;;  %v3284_v17 = vld [vmem:[%s3937_s22 + $0x1cc] ss:$12 sps:$4 sm:$0xff]   ;;  %v3288_v20 = vld [vmem:[%s3937_s22 + $0x34] ss:$12 sps:$4 sm:$0xff]   ;;  %v3293_v23 = vld [vmem:[%s3937_s22 + $0x1b0] ss:$12 sps:$4 sm:$0xff]  }
  0x5a   : > { %2118 = vmatprep.subr.bf16.mxu1 %v3272_v9  ;;  %v3290_v21 = vld [vmem:[%s3937_s22 + $0x1b4] ss:$12 sps:$4 sm:$0xff]   ;;  %v3294_v24 = vld [vmem:[%s3937_s22 + $0x1c] ss:$12 sps:$4 sm:$0xff]   ;;  %v3298_v26 = vld [vmem:[%s3937_s22 + $0x18] ss:$12 sps:$4 sm:$0xff]  }
  0x5b   : > { %v3296_v25 = vld [vmem:[%s3937_s22 + $0x19c] ss:$12 sps:$4 sm:$0xff]   ;;  %v3299_v27 = vld [vmem:[%s3937_s22 + $0x198] ss:$12 sps:$4 sm:$0xff]   ;;  %v3304_v30 = vld [vmem:[%s3937_s22] ss:$12 sps:$4 sm:$0xff]  }
  0x5c   : > { %2078 = vmatpush1.bf16.msra.mxu0 %v3274_v10  ;;  %v3300_v28 = vld [vmem:[%s3937_s22 + $0x4] ss:$12 sps:$4 sm:$0xff]   ;;  %v3305_v31 = vld [vmem:[%s3937_s22 + $0x180] ss:$12 sps:$4 sm:$0xff]   ;;  %v3310_v34 = vld [vmem:[%s3937_s22 + $0x168] ss:$12 sps:$4 sm:$0xff]  }
  0x5d   : > { %2119 = vmatpush1.bf16.msra.mxu1 %v3275_v11  ;;  %2079 = vmatprep.subr.bf16.mxu0 %v3276_v12  ;;  %v3302_v29 = vld [vmem:[%s3937_s22 + $0x184] ss:$12 sps:$4 sm:$0xff]   ;;  %v3306_v32 = vld [vmem:[%s3937_s22 + $0x16c] ss:$12 sps:$4 sm:$0xff]   ;;  %v3311_v35 = vld [vmem:[%s3937_s22 + $0x2e8] ss:$12 sps:$4 sm:$0xff]  }
  0x5e   : > { %2120 = vmatprep.subr.bf16.mxu1 %v3278_v13  ;;  %v3308_v33 = vld [vmem:[%s3937_s22 + $0x2ec] ss:$12 sps:$4 sm:$0xff]   ;;  %v3312_v36 = vld [vmem:[%s3937_s22 + $0x154] ss:$12 sps:$4 sm:$0xff]   ;;  %v3316_v38 = vld [vmem:[%s3937_s22 + $0x150] ss:$12 sps:$4 sm:$0xff]  }
  0x5f   : > { %v3314_v37 = vld [vmem:[%s3937_s22 + $0x2d4] ss:$12 sps:$4 sm:$0xff]   ;;  %v3317_v39 = vld [vmem:[%s3937_s22 + $0x2d0] ss:$12 sps:$4 sm:$0xff]   ;;  %v3322_v42 = vld [vmem:[%s3937_s22 + $0x138] ss:$12 sps:$4 sm:$0xff]  }
  0x60   : > { %2080 = vmatpush1.bf16.msra.mxu0 %v3280_v14  ;;  %v3318_v40 = vld [vmem:[%s3937_s22 + $0x13c] ss:$12 sps:$4 sm:$0xff]   ;;  %v3323_v43 = vld [vmem:[%s3937_s22 + $0x2b8] ss:$12 sps:$4 sm:$0xff]   ;;  %v292_v46 = vld [vmem:[#allocation3 + $0x8] sm:$0xff]  ;;  %s3172_s5 = smul.u32 3, %s3934_s9 }
  0x61   : > { %2121 = vmatpush1.bf16.msra.mxu1 %v3281_v15  ;;  %2081 = vmatprep.subr.bf16.mxu0 %v3282_v16  ;;  %v3320_v41 = vld [vmem:[%s3937_s22 + $0x2bc] ss:$12 sps:$4 sm:$0xff]   ;;  %v3324_v44 = vld [vmem:[%s3937_s22 + $0x124] ss:$12 sps:$4 sm:$0xff]   ;;  %v3328_v47 = vld [vmem:[%s3937_s22 + $0x120] ss:$12 sps:$4 sm:$0xff]   ;;  %v3991_v49 = vpack.c.bf16 %v292_v46, %v292_v46 }
  0x62   : > { %2122 = vmatprep.subr.bf16.mxu1 %v3284_v17  ;;  %v3326_v45 = vld [vmem:[%s3937_s22 + $0x2a4] ss:$12 sps:$4 sm:$0xff]   ;;  %v3329_v48 = vld [vmem:[%s3937_s22 + $0x2a0] ss:$12 sps:$4 sm:$0xff]   ;;  %v3334_v54 = vld [vmem:[%s3937_s22 + $0x108] ss:$12 sps:$4 sm:$0xff]  }
  0x63   : > { %v294_v50 = vld [vmem:[#allocation3 + $0x18] sm:$0xff]  ;;  %v3330_v51 = vld [vmem:[%s3937_s22 + $0x10c] ss:$12 sps:$4 sm:$0xff]   ;;  %2105 = vmatprep.mubr.bf16.mxu0 %v3991_v49  ;;  %v3335_v55 = vld [vmem:[%s3937_s22 + $0x288] ss:$12 sps:$4 sm:$0xff]   ;;  %s247_s20 = scalar_lea.vmem [#allocation8], %s3172_s5 }
  0x64   : > { %2082 = vmatpush1.bf16.msra.mxu0 %v3286_v18  ;;  %v3994_v52 = vpack.c.bf16 %v294_v50, %v294_v50  ;;  %v3332_v53 = vld [vmem:[%s3937_s22 + $0x28c] ss:$12 sps:$4 sm:$0xff]   ;;  %v3336_v56 = vld [vmem:[%s3937_s22 + $0xf4] ss:$12 sps:$4 sm:$0xff]   ;;  %v3340_v58 = vld [vmem:[%s3937_s22 + $0xf0] ss:$12 sps:$4 sm:$0xff]  }
  0x65   : > { %2123 = vmatpush1.bf16.msra.mxu1 %v3287_v19  ;;  %2083 = vmatprep.subr.bf16.mxu0 %v3288_v20  ;;  %v3338_v57 = vld [vmem:[%s3937_s22 + $0x274] ss:$12 sps:$4 sm:$0xff]   ;;  %v3341_v59 = vld [vmem:[%s3937_s22 + $0x270] ss:$12 sps:$4 sm:$0xff]   ;;  %v3346_v62 = vld [vmem:[%s3937_s22 + $0xd8] ss:$12 sps:$4 sm:$0xff]  }
  0x66   : > { %2124 = vmatprep.subr.bf16.mxu1 %v3290_v21  ;;  %2146 = vmatprep.mubr.bf16.mxu1 %v3994_v52  ;;  %v3342_v60 = vld [vmem:[%s3937_s22 + $0xdc] ss:$12 sps:$4 sm:$0xff]   ;;  %v3347_v63 = vld [vmem:[%s3937_s22 + $0x258] ss:$12 sps:$4 sm:$0xff]   ;;  %v3352_v2 = vld [vmem:[%s3937_s22 + $0xc0] ss:$12 sps:$4 sm:$0xff]  }
  0x67   : > { %v3344_v61 = vld [vmem:[%s3937_s22 + $0x25c] ss:$12 sps:$4 sm:$0xff]   ;;  %v3348_v0 = vld [vmem:[%s3937_s22 + $0xc4] ss:$12 sps:$4 sm:$0xff]   ;;  %v3353_v3 = vld [vmem:[%s3937_s22 + $0x240] ss:$12 sps:$4 sm:$0xff]  }
  0x68   : > { %2084 = vmatpush1.bf16.msra.mxu0 %v3292_v22  ;;  %v3350_v1 = vld [vmem:[%s3937_s22 + $0x244] ss:$12 sps:$4 sm:$0xff]   ;;  %v291_v4 = vld [vmem:[#allocation3] sm:$0xff]  ;;  %v293_v5 = vld [vmem:[#allocation3 + $0x10] sm:$0xff]  ;;  %s3173_s23 = smul.u32 12, %s3934_s9  ;;  %s2607_s30 = scalar_lea.sflag [#allocation5], %s3934_s9 }
  0x69   : > { %2125 = vmatpush1.bf16.msra.mxu1 %v3293_v23  ;;  %2085 = vmatprep.subr.bf16.mxu0 %v3294_v24  ;;  %v3356_v6 = vld [vmem:[%s3937_s22 + $0x3ac] ss:$12 sps:$4 sm:$0xff]   ;;  %v4015_v8 = vpack.c.bf16 %v291_v4, %v291_v4  ;;  %v4017_v9 = vpack.c.bf16 %v293_v5, %v293_v5  ;;  %v3354_v10 = vld [vmem:[%s3937_s22 + $0x3a8] ss:$12 sps:$4 sm:$0xff]   ;;  %v3360_v14 = vld [vmem:[%s3937_s22 + $0x390] ss:$12 sps:$4 sm:$0xff]  }
  0x6a   : > { %2126 = vmatprep.subr.bf16.mxu1 %v3296_v25  ;;  %v3359_v7 = vld [vmem:[%s3937_s22 + $0x52c] ss:$12 sps:$4 sm:$0xff]   ;;  %v3357_v11 = vld [vmem:[%s3937_s22 + $0x528] ss:$12 sps:$4 sm:$0xff]   ;;  %v3363_v15 = vld [vmem:[%s3937_s22 + $0x510] ss:$12 sps:$4 sm:$0xff]  }
  0x6b   : > { %v3362_v12 = vld [vmem:[%s3937_s22 + $0x394] ss:$12 sps:$4 sm:$0xff]   ;;  %v3368_v16 = vld [vmem:[%s3937_s22 + $0x37c] ss:$12 sps:$4 sm:$0xff]   ;;  %v3366_v18 = vld [vmem:[%s3937_s22 + $0x378] ss:$12 sps:$4 sm:$0xff]  }
  0x6c   : > { %2086 = vmatpush1.bf16.msra.mxu0 %v3298_v26  ;;  %v3365_v13 = vld [vmem:[%s3937_s22 + $0x514] ss:$12 sps:$4 sm:$0xff]   ;;  %v3371_v17 = vld [vmem:[%s3937_s22 + $0x4fc] ss:$12 sps:$4 sm:$0xff]   ;;  %v3369_v19 = vld [vmem:[%s3937_s22 + $0x4f8] ss:$12 sps:$4 sm:$0xff]  }
  0x6d   : > { %2127 = vmatpush1.bf16.msra.mxu1 %v3299_v27  ;;  %2087 = vmatprep.subr.bf16.mxu0 %v3300_v28  ;;  %v3374_v20 = vld [vmem:[%s3937_s22 + $0x364] ss:$12 sps:$4 sm:$0xff]   ;;  %v3372_v22 = vld [vmem:[%s3937_s22 + $0x360] ss:$12 sps:$4 sm:$0xff]   ;;  %v3378_v26 = vld [vmem:[%s3937_s22 + $0x348] ss:$12 sps:$4 sm:$0xff]  }
  0x6e   : > { %2128 = vmatprep.subr.bf16.mxu1 %v3302_v29  ;;  %v3377_v21 = vld [vmem:[%s3937_s22 + $0x4e4] ss:$12 sps:$4 sm:$0xff]   ;;  %v3375_v23 = vld [vmem:[%s3937_s22 + $0x4e0] ss:$12 sps:$4 sm:$0xff]   ;;  %v3381_v27 = vld [vmem:[%s3937_s22 + $0x4c8] ss:$12 sps:$4 sm:$0xff]  }
  0x6f   : > { %v3380_v24 = vld [vmem:[%s3937_s22 + $0x34c] ss:$12 sps:$4 sm:$0xff]   ;;  %v3386_v28 = vld [vmem:[%s3937_s22 + $0x334] ss:$12 sps:$4 sm:$0xff]   ;;  %v3432_v4 = vld [vmem:[%s3937_s22 + $0x3f0] ss:$12 sps:$4 sm:$0xff]  }
  0x70   : > { %2088 = vmatpush1.bf16.msra.mxu0 %v3304_v30  ;;  %v3383_v25 = vld [vmem:[%s3937_s22 + $0x4cc] ss:$12 sps:$4 sm:$0xff]   ;;  %v3389_v29 = vld [vmem:[%s3937_s22 + $0x4b4] ss:$12 sps:$4 sm:$0xff]   ;;  %v3384_v30 = vld [vmem:[%s3937_s22 + $0x330] ss:$12 sps:$4 sm:$0xff]  }
  0x71   : > { %2129 = vmatpush1.bf16.msra.mxu1 %v3305_v31  ;;  %2089 = vmatprep.subr.bf16.mxu0 %v3306_v32  ;;  %v3387_v31 = vld [vmem:[%s3937_s22 + $0x4b0] ss:$12 sps:$4 sm:$0xff]   ;;  %v3402_v46 = vld [vmem:[%s3937_s22 + $0x468] ss:$12 sps:$4 sm:$0xff]   ;;  %s4253_s28 = scalar_lea.vmem [#allocation9], %s3173_s23  ;;  %s3029_s8 = smul.u32 192, %s3768_s15 }
  0x72   : > { %2130 = vmatprep.subr.bf16.mxu1 %v3308_v33  ;;  %v3392_v32 = vld [vmem:[%s3937_s22 + $0x31c] ss:$12 sps:$4 sm:$0xff]   ;;  %v3413_v50 = vld [vmem:[%s3937_s22 + $0x5d4] ss:$12 sps:$4 sm:$0xff]   ;;  %s2623_s11 = sshll.u32 %s4253_s28, 4  ;;  %p4322_p13 = scmp.ne.s32.totalorder %s4314_s25, 0  ;;  %s2624_s11 = int_to_ptr.vmem [resolvable:$true] %s2623_s11 }
  0x73   : > { %v3395_v33 = vld [vmem:[%s3937_s22 + $0x49c] ss:$12 sps:$4 sm:$0xff]   ;;  %s4261_s27 = scalar_lea.hbm %s4306_s3, %s3029_s8  ;;  %s3692_s6 = scalar_lea.vmem %s2624_s11, 192 }
  0x74   : > { %2090 = vmatpush2.bf16.msra.mxu0 %v3310_v34  ;;  %v296_v34 = vld [vmem:[#allocation3 + $0x28] sm:$0xff]  ;;  %p3693_p8 = scmp.ne.s32.totalorder %s2624_s11, %s3692_s6  ;;  %s3787_s15 = smov [#allocation9]  }
  0x75   : > { %2131 = vmatpush2.bf16.msra.mxu1 %v3311_v35  ;;  %2091 = vmatprep.subr.bf16.mxu0 %v3312_v36  ;;  %v3390_v35 = vld [vmem:[%s3937_s22 + $0x318] ss:$12 sps:$4 sm:$0xff]   ;;  %v4046_v36 = vpack.c.bf16 %v296_v34, %v296_v34  ;;  %v3435_v5 = vld [vmem:[%s3937_s22 + $0x570] ss:$12 sps:$4 sm:$0xff]   ;;  %s3696_s7 = sshll.u32 %s3787_s15, 4  ;;  %s3697_s7 = int_to_ptr.vmem [resolvable:$false] %s3696_s7 }
  0x76   : > { %2132 = vmatprep.subr.bf16.mxu1 %v3314_v37  ;;  %v3393_v37 = vld [vmem:[%s3937_s22 + $0x498] ss:$12 sps:$4 sm:$0xff]   ;;  %p3694_p5 = pnand %p3693_p8, %p4322_p13  ;;  %s3698_s4 = scalar_lea.vmem %s3697_s7, 384 }
  0x77   : > { %v3470_v34 = vld [vmem:[%s3937_s22 + $0x664] ss:$12 sps:$4 sm:$0xff]   ;;  %p3699_p12 = scmp.lt.s32.totalorder %s2624_s11, %s3697_s7  ;;  %p3700_p0 = scmp.lt.s32.totalorder %s3698_s4, %s3692_s6 }
  0x78   : > { %2092 = vmatpush2.bf16.msra.mxu0 %v3316_v38  ;;  %v3398_v38 = vld [vmem:[%s3937_s22 + $0x304] ss:$12 sps:$4 sm:$0xff]   ;;  %p3695_p9 = pneg %p3694_p5 }
  0x79   : > { %2133 = vmatpush2.bf16.msra.mxu1 %v3317_v39  ;;  %2093 = vmatprep.subr.bf16.mxu0 %v3318_v40  ;;  %v298_v39 = vld [vmem:[#allocation3 + $0x38] sm:$0xff]  ;;  %p3701_p2 = por %p3700_p0, %p3699_p12 }
  0x7a   : > { %2134 = vmatprep.subr.bf16.mxu1 %v3320_v41  ;;  %v3401_v40 = vld [vmem:[%s3937_s22 + $0x484] ss:$12 sps:$4 sm:$0xff]   ;;  %v4051_v41 = vpack.c.bf16 %v298_v39, %v298_v39  ;;  %v3471_v39 = vld [vmem:[%s3937_s22 + $0x7e0] ss:$12 sps:$4 sm:$0xff]  }
  0x7b   : > { %p3702_p4 = pnand %p3701_p2, %p3695_p9 }
  0x7c   : > { %2094 = vmatpush2.bf16.msra.mxu0 %v3322_v42  ;;  %v3396_v42 = vld [vmem:[%s3937_s22 + $0x300] ss:$12 sps:$4 sm:$0xff]  }
  0x7d   : > { %2135 = vmatpush2.bf16.msra.mxu1 %v3323_v43  ;;  %2095 = vmatprep.subr.bf16.mxu0 %v3324_v44  ;;  %v3399_v43 = vld [vmem:[%s3937_s22 + $0x480] ss:$12 sps:$4 sm:$0xff]  }
  0x7e   : > { %2136 = vmatprep.subr.bf16.mxu1 %v3326_v45  ;;  %v3404_v44 = vld [vmem:[%s3937_s22 + $0x46c] ss:$12 sps:$4 sm:$0xff]  }
  0x7f   : > { %v3407_v45 = vld [vmem:[%s3937_s22 + $0x5ec] ss:$12 sps:$4 sm:$0xff]  }
  0x80   : > { %2096 = vmatpush2.bf16.msra.mxu0 %v3328_v47  ;;  %v3405_v47 = vld [vmem:[%s3937_s22 + $0x5e8] ss:$12 sps:$4 sm:$0xff]  }
  0x81   : > { %2137 = vmatpush2.bf16.msra.mxu1 %v3329_v48  ;;  %2097 = vmatprep.subr.bf16.mxu0 %v3330_v51  ;;  %v3410_v48 = vld [vmem:[%s3937_s22 + $0x454] ss:$12 sps:$4 sm:$0xff]   ;;  %v3408_v51 = vld [vmem:[%s3937_s22 + $0x450] ss:$12 sps:$4 sm:$0xff]  }
  0x82   : > { %2138 = vmatprep.subr.bf16.mxu1 %v3332_v53  ;;  %v3411_v53 = vld [vmem:[%s3937_s22 + $0x5d0] ss:$12 sps:$4 sm:$0xff]  }
  0x84   : > { %2098 = vmatpush2.bf16.msra.mxu0 %v3334_v54  ;;  %v3416_v54 = vld [vmem:[%s3937_s22 + $0x43c] ss:$12 sps:$4 sm:$0xff]  }
  0x85   : > { %2139 = vmatpush2.bf16.msra.mxu1 %v3335_v55  ;;  %2099 = vmatprep.subr.bf16.mxu0 %v3336_v56  ;;  %v3419_v55 = vld [vmem:[%s3937_s22 + $0x5bc] ss:$12 sps:$4 sm:$0xff]   ;;  %v3414_v56 = vld [vmem:[%s3937_s22 + $0x438] ss:$12 sps:$4 sm:$0xff]  }
  0x86   : > { %2140 = vmatprep.subr.bf16.mxu1 %v3338_v57  ;;  %v3417_v57 = vld [vmem:[%s3937_s22 + $0x5b8] ss:$12 sps:$4 sm:$0xff]  }
  0x88   : > { %2100 = vmatpush2.bf16.msra.mxu0 %v3340_v58  ;;  %v3422_v58 = vld [vmem:[%s3937_s22 + $0x424] ss:$12 sps:$4 sm:$0xff]  }
  0x89   : > { %2141 = vmatpush2.bf16.msra.mxu1 %v3341_v59  ;;  %2101 = vmatprep.subr.bf16.mxu0 %v3342_v60  ;;  %v3425_v59 = vld [vmem:[%s3937_s22 + $0x5a4] ss:$12 sps:$4 sm:$0xff]   ;;  %v3420_v60 = vld [vmem:[%s3937_s22 + $0x420] ss:$12 sps:$4 sm:$0xff]  }
  0x8a   : > { %2142 = vmatprep.subr.bf16.mxu1 %v3344_v61  ;;  %v3423_v61 = vld [vmem:[%s3937_s22 + $0x5a0] ss:$12 sps:$4 sm:$0xff]  }
  0x8c   : > { %2102 = vmatpush2.bf16.msra.mxu0 %v3346_v62  ;;  %v3428_v62 = vld [vmem:[%s3937_s22 + $0x40c] ss:$12 sps:$4 sm:$0xff]  }
  0x8d   : > { %2143 = vmatpush2.bf16.msra.mxu1 %v3347_v63  ;;  %2103 = vmatprep.subr.bf16.mxu0 %v3348_v0  ;;  %v3431_v63 = vld [vmem:[%s3937_s22 + $0x58c] ss:$12 sps:$4 sm:$0xff]   ;;  %v3426_v0 = vld [vmem:[%s3937_s22 + $0x408] ss:$12 sps:$4 sm:$0xff]  }
  0x8e   : > { %2144 = vmatprep.subr.bf16.mxu1 %v3350_v1  ;;  %v3429_v1 = vld [vmem:[%s3937_s22 + $0x588] ss:$12 sps:$4 sm:$0xff]  }
  0x90   : > { %2104 = vmatpush2.bf16.msra.mxu0 %v3352_v2  ;;  %v3434_v2 = vld [vmem:[%s3937_s22 + $0x3f4] ss:$12 sps:$4 sm:$0xff]  }
  0x91   : > { %2145 = vmatpush2.bf16.msra.mxu1 %v3353_v3  ;;  %2155 = vmatprep.subr.bf16.mxu0 %v3356_v6  ;;  %v3437_v3 = vld [vmem:[%s3937_s22 + $0x574] ss:$12 sps:$4 sm:$0xff]   ;;  %v3440_v6 = vld [vmem:[%s3937_s22 + $0x3dc] ss:$12 sps:$4 sm:$0xff]  }
  0x92   : > { %2196 = vmatprep.subr.bf16.mxu1 %v3359_v7  ;;  %v3443_v7 = vld [vmem:[%s3937_s22 + $0x55c] ss:$12 sps:$4 sm:$0xff]  }
  0x93   : > { %2106 = vmatmul.mubr.bf16.vlgmr.msra.gmra.mxu0 %v4015_v8 }
  0x94   : > { %2147 = vmatmul.mubr.bf16.vlgmr.msra.gmra.mxu1 %v4017_v9  ;;  %2156 = vmatpush1.bf16.msra.mxu0 %v3354_v10  ;;  %v3438_v10 = vld [vmem:[%s3937_s22 + $0x3d8] ss:$12 sps:$4 sm:$0xff]  }
  0x95   : > { %2197 = vmatpush1.bf16.msra.mxu1 %v3357_v11  ;;  %2157 = vmatprep.subr.bf16.mxu0 %v3362_v12  ;;  %v3441_v11 = vld [vmem:[%s3937_s22 + $0x558] ss:$12 sps:$4 sm:$0xff]  }
  0x96   : > { %2198 = vmatprep.subr.bf16.mxu1 %v3365_v13  ;;  %2187 = vmatprep.mubr.bf16.mxu0 %v4046_v36  ;;  %v3446_v12 = vld [vmem:[%s3937_s22 + $0x3c4] ss:$12 sps:$4 sm:$0xff]  }
  0x97   : > { %2228 = vmatprep.mubr.bf16.mxu1 %v4051_v41  ;;  %v3449_v13 = vld [vmem:[%s3937_s22 + $0x544] ss:$12 sps:$4 sm:$0xff]  }
  0x98   : > { %2158 = vmatpush1.bf16.msra.mxu0 %v3360_v14  ;;  %v3444_v14 = vld [vmem:[%s3937_s22 + $0x3c0] ss:$12 sps:$4 sm:$0xff]  }
  0x99   : > { %2199 = vmatpush1.bf16.msra.mxu1 %v3363_v15  ;;  %2159 = vmatprep.subr.bf16.mxu0 %v3368_v16  ;;  %v3447_v15 = vld [vmem:[%s3937_s22 + $0x540] ss:$12 sps:$4 sm:$0xff]  }
  0x9a   : > { %2200 = vmatprep.subr.bf16.mxu1 %v3371_v17  ;;  %v295_v16 = vld [vmem:[#allocation3 + $0x20] sm:$0xff] }
  0x9b   : > { %v3452_v17 = vld [vmem:[%s3937_s22 + $0x6ac] ss:$12 sps:$4 sm:$0xff]  }
  0x9c   : > { %2160 = vmatpush1.bf16.msra.mxu0 %v3366_v18  ;;  %v297_v18 = vld [vmem:[#allocation3 + $0x30] sm:$0xff] }
  0x9d   : > { %2201 = vmatpush1.bf16.msra.mxu1 %v3369_v19  ;;  %2161 = vmatprep.subr.bf16.mxu0 %v3374_v20  ;;  %v3455_v19 = vld [vmem:[%s3937_s22 + $0x82c] ss:$12 sps:$4 sm:$0xff]   ;;  %v4091_v20 = vpack.c.bf16 %v295_v16, %v295_v16  ;;  %v3518_v16 = vld [vmem:[%s3937_s22 + $0x708] ss:$12 sps:$4 sm:$0xff]  }
  0x9e   : > { %2202 = vmatprep.subr.bf16.mxu1 %v3377_v21  ;;  %v3450_v21 = vld [vmem:[%s3937_s22 + $0x6a8] ss:$12 sps:$4 sm:$0xff]  }
  0xa0   : > { %2162 = vmatpush1.bf16.msra.mxu0 %v3372_v22  ;;  %v4094_v22 = vpack.c.bf16 %v297_v18, %v297_v18  ;;  %v3525_v18 = vld [vmem:[%s3937_s22 + $0x6f4] ss:$12 sps:$4 sm:$0xff]  }
  0xa1   : > { %2203 = vmatpush1.bf16.msra.mxu1 %v3375_v23  ;;  %2163 = vmatprep.subr.bf16.mxu0 %v3380_v24  ;;  %v3453_v23 = vld [vmem:[%s3937_s22 + $0x828] ss:$12 sps:$4 sm:$0xff]  }
  0xa2   : > { %2204 = vmatprep.subr.bf16.mxu1 %v3383_v25  ;;  %v3458_v24 = vld [vmem:[%s3937_s22 + $0x694] ss:$12 sps:$4 sm:$0xff]  }
  0xa3   : > { %v3461_v25 = vld [vmem:[%s3937_s22 + $0x814] ss:$12 sps:$4 sm:$0xff]  }
  0xa4   : > { %2164 = vmatpush1.bf16.msra.mxu0 %v3378_v26  ;;  %v3456_v26 = vld [vmem:[%s3937_s22 + $0x690] ss:$12 sps:$4 sm:$0xff]  }
  0xa5   : > { %2205 = vmatpush1.bf16.msra.mxu1 %v3381_v27  ;;  %2165 = vmatprep.subr.bf16.mxu0 %v3386_v28  ;;  %v3459_v27 = vld [vmem:[%s3937_s22 + $0x810] ss:$12 sps:$4 sm:$0xff]  }
  0xa6   : > { %2206 = vmatprep.subr.bf16.mxu1 %v3389_v29  ;;  %v3464_v28 = vld [vmem:[%s3937_s22 + $0x67c] ss:$12 sps:$4 sm:$0xff]  }
  0xa7   : > { %v3467_v29 = vld [vmem:[%s3937_s22 + $0x7fc] ss:$12 sps:$4 sm:$0xff]  }
  0xa8   : > { %2166 = vmatpush1.bf16.msra.mxu0 %v3384_v30  ;;  %v3784_v30 = vmov 0  }
  0xa9   : > { %2207 = vmatpush1.bf16.msra.mxu1 %v3387_v31  ;;  %2167 = vmatprep.subr.bf16.mxu0 %v3392_v32  ;;  %v3462_v31 = vld [vmem:[%s3937_s22 + $0x678] ss:$12 sps:$4 sm:$0xff]   ;;  %v300_v32 = vld [vmem:[#allocation3 + $0x48] sm:$0xff] }
  0xaa   : > { %2208 = vmatprep.subr.bf16.mxu1 %v3395_v33  ;;  %v3465_v33 = vld [vmem:[%s3937_s22 + $0x7f8] ss:$12 sps:$4 sm:$0xff]  }
  0xac   : > { %2168 = vmatpush1.bf16.msra.mxu0 %v3390_v35  ;;  %v4108_v35 = vpack.c.bf16 %v300_v32, %v300_v32  ;;  %v299_v32 = vld [vmem:[#allocation3 + $0x40] sm:$0xff] }
  0xad   : > { %2209 = vmatpush1.bf16.msra.mxu1 %v3393_v37  ;;  %2169 = vmatprep.subr.bf16.mxu0 %v3398_v38  ;;  %v3473_v37 = vld [vmem:[%s3937_s22 + $0x7e4] ss:$12 sps:$4 sm:$0xff]   ;;  %v3468_v38 = vld [vmem:[%s3937_s22 + $0x660] ss:$12 sps:$4 sm:$0xff]  }
  0xae   : > { %2210 = vmatprep.subr.bf16.mxu1 %v3401_v40  ;;  %v3476_v40 = vld [vmem:[%s3937_s22 + $0x64c] ss:$12 sps:$4 sm:$0xff]  }
  0xb0   : > { %2170 = vmatpush1.bf16.msra.mxu0 %v3396_v42  ;;  %v3479_v42 = vld [vmem:[%s3937_s22 + $0x7cc] ss:$12 sps:$4 sm:$0xff]  }
  0xb1   : > { %2211 = vmatpush1.bf16.msra.mxu1 %v3399_v43  ;;  %2171 = vmatprep.subr.bf16.mxu0 %v3404_v44  ;;  %v3474_v43 = vld [vmem:[%s3937_s22 + $0x648] ss:$12 sps:$4 sm:$0xff]  }
  0xb2   : > { %2212 = vmatprep.subr.bf16.mxu1 %v3407_v45  ;;  %v3477_v44 = vld [vmem:[%s3937_s22 + $0x7c8] ss:$12 sps:$4 sm:$0xff]  }
  0xb3   : > { %v3482_v45 = vld [vmem:[%s3937_s22 + $0x634] ss:$12 sps:$4 sm:$0xff]  }
  0xb4   : > { %2172 = vmatpush2.bf16.msra.mxu0 %v3402_v46  ;;  %v3485_v46 = vld [vmem:[%s3937_s22 + $0x7b4] ss:$12 sps:$4 sm:$0xff]  }
  0xb5   : > { %2213 = vmatpush2.bf16.msra.mxu1 %v3405_v47  ;;  %2173 = vmatprep.subr.bf16.mxu0 %v3410_v48  ;;  %v3480_v47 = vld [vmem:[%s3937_s22 + $0x630] ss:$12 sps:$4 sm:$0xff]  }
  0xb6   : > { %2214 = vmatprep.subr.bf16.mxu1 %v3413_v50  ;;  %v3483_v48 = vld [vmem:[%s3937_s22 + $0x7b0] ss:$12 sps:$4 sm:$0xff]  }
  0xb7   : > { %v3488_v50 = vld [vmem:[%s3937_s22 + $0x61c] ss:$12 sps:$4 sm:$0xff]  }
  0xb8   : > { %2174 = vmatpush2.bf16.msra.mxu0 %v3408_v51  ;;  %v3491_v51 = vld [vmem:[%s3937_s22 + $0x79c] ss:$12 sps:$4 sm:$0xff]  }
  0xb9   : > { %2215 = vmatpush2.bf16.msra.mxu1 %v3411_v53  ;;  %2175 = vmatprep.subr.bf16.mxu0 %v3416_v54  ;;  %v3486_v53 = vld [vmem:[%s3937_s22 + $0x618] ss:$12 sps:$4 sm:$0xff]  }
  0xba   : > { %2216 = vmatprep.subr.bf16.mxu1 %v3419_v55  ;;  %v3489_v54 = vld [vmem:[%s3937_s22 + $0x798] ss:$12 sps:$4 sm:$0xff]  }
  0xbb   : > { %v3494_v55 = vld [vmem:[%s3937_s22 + $0x604] ss:$12 sps:$4 sm:$0xff]  }
  0xbc   : > { %2176 = vmatpush2.bf16.msra.mxu0 %v3414_v56  ;;  %v3497_v56 = vld [vmem:[%s3937_s22 + $0x784] ss:$12 sps:$4 sm:$0xff]  }
  0xbd   : > { %2217 = vmatpush2.bf16.msra.mxu1 %v3417_v57  ;;  %2177 = vmatprep.subr.bf16.mxu0 %v3422_v58  ;;  %v3492_v57 = vld [vmem:[%s3937_s22 + $0x600] ss:$12 sps:$4 sm:$0xff]  }
  0xbe   : > { %2218 = vmatprep.subr.bf16.mxu1 %v3425_v59  ;;  %v3495_v58 = vld [vmem:[%s3937_s22 + $0x780] ss:$12 sps:$4 sm:$0xff]  }
  0xbf   : > { %v3500_v59 = vld [vmem:[%s3937_s22 + $0x76c] ss:$12 sps:$4 sm:$0xff]  }
  0xc0   : > { %2178 = vmatpush2.bf16.msra.mxu0 %v3420_v60  ;;  %v301_v60 = vld [vmem:[#allocation3 + $0x50] sm:$0xff] }
  0xc1   : > { %2219 = vmatpush2.bf16.msra.mxu1 %v3423_v61  ;;  %2179 = vmatprep.subr.bf16.mxu0 %v3428_v62  ;;  %v3501_v61 = vld [vmem:[%s3937_s22 + $0x170] ss:$12 sps:$4 sm:$0xff]   ;;  %v3498_v62 = vld [vmem:[%s3937_s22 + $0x768] ss:$12 sps:$4 sm:$0xff]  }
  0xc2   : > { %2220 = vmatprep.subr.bf16.mxu1 %v3431_v63  ;;  %v4133_v63 = vpack.c.bf16 %v301_v60, %v301_v60  ;;  %v3562_v60 = vld [vmem:[%s3937_s22 + $0x260] ss:$12 sps:$4 sm:$0xff]  }
  0xc4   : > { %2180 = vmatpush2.bf16.msra.mxu0 %v3426_v0  ;;  %v3502_v0 = vld [vmem:[%s3937_s22 + $0xb0] ss:$12 sps:$4 sm:$0xff]  }
  0xc5   : > { %2221 = vmatpush2.bf16.msra.mxu1 %v3429_v1  ;;  %2181 = vmatprep.subr.bf16.mxu0 %v3434_v2  ;;  %v3505_v1 = vld [vmem:[%s3937_s22 + $0x754] ss:$12 sps:$4 sm:$0xff]   ;;  %v3506_v2 = vld [vmem:[%s3937_s22 + $0x158] ss:$12 sps:$4 sm:$0xff]  }
  0xc6   : > { %2222 = vmatprep.subr.bf16.mxu1 %v3437_v3  ;;  %v3503_v3 = vld [vmem:[%s3937_s22 + $0x750] ss:$12 sps:$4 sm:$0xff]  }
  0xc8   : > { %2182 = vmatpush2.bf16.msra.mxu0 %v3432_v4  ;;  %v3507_v4 = vld [vmem:[%s3937_s22 + $0x98] ss:$12 sps:$4 sm:$0xff]  }
  0xc9   : > { %2223 = vmatpush2.bf16.msra.mxu1 %v3435_v5  ;;  %2183 = vmatprep.subr.bf16.mxu0 %v3440_v6  ;;  %v3510_v5 = vld [vmem:[%s3937_s22 + $0x73c] ss:$12 sps:$4 sm:$0xff]   ;;  %v3511_v6 = vld [vmem:[%s3937_s22 + $0x140] ss:$12 sps:$4 sm:$0xff]  }
  0xca   : > { %2224 = vmatprep.subr.bf16.mxu1 %v3443_v7  ;;  %v3508_v7 = vld [vmem:[%s3937_s22 + $0x738] ss:$12 sps:$4 sm:$0xff]  }
  0xcc   : > { %2184 = vmatpush2.bf16.msra.mxu0 %v3438_v10  ;;  %v3512_v10 = vld [vmem:[%s3937_s22 + $0x80] ss:$12 sps:$4 sm:$0xff]  }
  0xcd   : > { %2225 = vmatpush2.bf16.msra.mxu1 %v3441_v11  ;;  %2185 = vmatprep.subr.bf16.mxu0 %v3446_v12  ;;  %v3515_v11 = vld [vmem:[%s3937_s22 + $0x724] ss:$12 sps:$4 sm:$0xff]   ;;  %v3516_v12 = vld [vmem:[%s3937_s22 + $0x128] ss:$12 sps:$4 sm:$0xff]  }
  0xce   : > { %2226 = vmatprep.subr.bf16.mxu1 %v3449_v13  ;;  %v3513_v13 = vld [vmem:[%s3937_s22 + $0x720] ss:$12 sps:$4 sm:$0xff]  }
  0xd0   : > { %2186 = vmatpush2.bf16.msra.mxu0 %v3444_v14  ;;  %v3517_v14 = vld [vmem:[%s3937_s22 + $0x68] ss:$12 sps:$4 sm:$0xff]  }
  0xd1   : > { %2227 = vmatpush2.bf16.msra.mxu1 %v3447_v15  ;;  %2237 = vmatprep.subr.bf16.mxu0 %v3452_v17  ;;  %v3520_v15 = vld [vmem:[%s3937_s22 + $0x70c] ss:$12 sps:$4 sm:$0xff]   ;;  %v3522_v17 = vld [vmem:[%s3937_s22 + $0x50] ss:$12 sps:$4 sm:$0xff]  }
  0xd2   : > { %2278 = vmatprep.subr.bf16.mxu1 %v3455_v19  ;;  %v3526_v19 = vld [vmem:[%s3937_s22 + $0xf8] ss:$12 sps:$4 sm:$0xff]  }
  0xd3   : > { %2188 = vmatmul.mubr.bf16.vlgmr.msra.gmra.mxu0 %v4091_v20 }
  0xd4   : > { %2229 = vmatmul.mubr.bf16.vlgmr.msra.gmra.mxu1 %v4094_v22  ;;  %2238 = vmatpush1.bf16.msra.mxu0 %v3450_v21  ;;  %v3523_v21 = vld [vmem:[%s3937_s22 + $0x6f0] ss:$12 sps:$4 sm:$0xff]  }
  0xd5   : > { %2279 = vmatpush1.bf16.msra.mxu1 %v3453_v23  ;;  %2239 = vmatprep.subr.bf16.mxu0 %v3458_v24  ;;  %v3527_v23 = vld [vmem:[%s3937_s22 + $0x38] ss:$12 sps:$4 sm:$0xff]   ;;  %v3530_v24 = vld [vmem:[%s3937_s22 + $0x6dc] ss:$12 sps:$4 sm:$0xff]  }
  0xd6   : > { %2280 = vmatprep.subr.bf16.mxu1 %v3461_v25  ;;  %2310 = vmatprep.mubr.bf16.mxu1 %v3784_v30  ;;  %v3531_v25 = vld [vmem:[%s3937_s22 + $0xe0] ss:$12 sps:$4 sm:$0xff]  }
  0xd7   : > { %2269 = vmatprep.mubr.bf16.mxu0 %v4108_v35  ;;  %v3533_v30 = vld [vmem:[%s3937_s22 + $0x6c0] ss:$12 sps:$4 sm:$0xff]  }
  0xd8   : > { %2240 = vmatpush1.bf16.msra.mxu0 %v3456_v26  ;;  %v3528_v26 = vld [vmem:[%s3937_s22 + $0x6d8] ss:$12 sps:$4 sm:$0xff]  }
  0xd9   : > { %2281 = vmatpush1.bf16.msra.mxu1 %v3459_v27  ;;  %2241 = vmatprep.subr.bf16.mxu0 %v3464_v28  ;;  %v3532_v27 = vld [vmem:[%s3937_s22 + $0x20] ss:$12 sps:$4 sm:$0xff]   ;;  %v3535_v28 = vld [vmem:[%s3937_s22 + $0x6c4] ss:$12 sps:$4 sm:$0xff]  }
  0xda   : > { %2282 = vmatprep.subr.bf16.mxu1 %v3467_v29  ;;  %v3536_v29 = vld [vmem:[%s3937_s22 + $0xc8] ss:$12 sps:$4 sm:$0xff]  }
  0xdc   : > { %2242 = vmatpush1.bf16.msra.mxu0 %v3462_v31  ;;  %v3537_v31 = vld [vmem:[%s3937_s22 + $0x8] ss:$12 sps:$4 sm:$0xff]  }
  0xdd   : > { %2283 = vmatpush1.bf16.msra.mxu1 %v3465_v33  ;;  %2243 = vmatprep.subr.bf16.mxu0 %v3470_v34  ;;  %v3538_v33 = vld [vmem:[%s3937_s22 + $0x2f0] ss:$12 sps:$4 sm:$0xff]  }
  0xde   : > { %2284 = vmatprep.subr.bf16.mxu1 %v3473_v37  ;;  %v3540_v34 = vld [vmem:[%s3937_s22 + $0x470] ss:$12 sps:$4 sm:$0xff]  }
  0xdf   : > { %v3539_v37 = vld [vmem:[%s3937_s22 + $0x230] ss:$12 sps:$4 sm:$0xff]  }
  0xe0   : > { %2244 = vmatpush1.bf16.msra.mxu0 %v3468_v38  ;;  %v4169_v38 = vpack.c.bf16 %v299_v32, %v299_v32  ;;  %v3598_v32 = vld [vmem:[%s3937_s22 + $0x548] ss:$12 sps:$4 sm:$0xff]  }
  0xe1   : > { %2285 = vmatpush1.bf16.msra.mxu1 %v3471_v39  ;;  %2245 = vmatprep.subr.bf16.mxu0 %v3476_v40  ;;  %v3541_v39 = vld [vmem:[%s3937_s22 + $0x3b0] ss:$12 sps:$4 sm:$0xff]   ;;  %v3542_v40 = vld [vmem:[%s3937_s22 + $0x2d8] ss:$12 sps:$4 sm:$0xff]  }
  0xe2   : > { %2286 = vmatprep.subr.bf16.mxu1 %v3479_v42  ;;  %v3544_v42 = vld [vmem:[%s3937_s22 + $0x458] ss:$12 sps:$4 sm:$0xff]  }
  0xe4   : > { %2246 = vmatpush1.bf16.msra.mxu0 %v3474_v43  ;;  %v3543_v43 = vld [vmem:[%s3937_s22 + $0x218] ss:$12 sps:$4 sm:$0xff]  }
  0xe5   : > { %2287 = vmatpush1.bf16.msra.mxu1 %v3477_v44  ;;  %2247 = vmatprep.subr.bf16.mxu0 %v3482_v45  ;;  %v3545_v44 = vld [vmem:[%s3937_s22 + $0x398] ss:$12 sps:$4 sm:$0xff]   ;;  %v3546_v45 = vld [vmem:[%s3937_s22 + $0x2c0] ss:$12 sps:$4 sm:$0xff]  }
  0xe6   : > { %2288 = vmatprep.subr.bf16.mxu1 %v3485_v46  ;;  %v3548_v46 = vld [vmem:[%s3937_s22 + $0x440] ss:$12 sps:$4 sm:$0xff]  }
  0xe8   : > { %2248 = vmatpush1.bf16.msra.mxu0 %v3480_v47  ;;  %v3547_v47 = vld [vmem:[%s3937_s22 + $0x200] ss:$12 sps:$4 sm:$0xff]  }
  0xe9   : > { %2289 = vmatpush1.bf16.msra.mxu1 %v3483_v48  ;;  %2249 = vmatprep.subr.bf16.mxu0 %v3488_v50  ;;  %v3549_v48 = vld [vmem:[%s3937_s22 + $0x380] ss:$12 sps:$4 sm:$0xff]   ;;  %v3552_v50 = vld [vmem:[%s3937_s22 + $0x428] ss:$12 sps:$4 sm:$0xff]  }
  0xea   : > { %2290 = vmatprep.subr.bf16.mxu1 %v3491_v51  ;;  %v3551_v51 = vld [vmem:[%s3937_s22 + $0x1e8] ss:$12 sps:$4 sm:$0xff]  }
  0xec   : > { %2250 = vmatpush1.bf16.msra.mxu0 %v3486_v53  ;;  %v3553_v53 = vld [vmem:[%s3937_s22 + $0x368] ss:$12 sps:$4 sm:$0xff]  }
  0xed   : > { %2291 = vmatpush1.bf16.msra.mxu1 %v3489_v54  ;;  %2251 = vmatprep.subr.bf16.mxu0 %v3494_v55  ;;  %v3555_v54 = vld [vmem:[%s3937_s22 + $0x1d0] ss:$12 sps:$4 sm:$0xff]  }
  0xee   : > { %2292 = vmatprep.subr.bf16.mxu1 %v3497_v56  ;;  %v3557_v55 = vld [vmem:[%s3937_s22 + $0x350] ss:$12 sps:$4 sm:$0xff]   ;;  %v3558_v56 = vld [vmem:[%s3937_s22 + $0x278] ss:$12 sps:$4 sm:$0xff]  }
  0xf0   : > { %2252 = vmatpush1.bf16.msra.mxu0 %v3492_v57  ;;  %v3560_v57 = vld [vmem:[%s3937_s22 + $0x3f8] ss:$12 sps:$4 sm:$0xff]  }
  0xf1   : > { %2293 = vmatpush1.bf16.msra.mxu1 %v3495_v58  ;;  %2253 = vmatprep.subr.bf16.mxu0 %v3500_v59  ;;  %v3559_v58 = vld [vmem:[%s3937_s22 + $0x1b8] ss:$12 sps:$4 sm:$0xff]  }
  0xf2   : > { %3030 = vmatprep.subr.bf16.mxu1 %v3501_v61  ;;  %v3561_v59 = vld [vmem:[%s3937_s22 + $0x338] ss:$12 sps:$4 sm:$0xff]   ;;  %v3564_v61 = vld [vmem:[%s3937_s22 + $0x3e0] ss:$12 sps:$4 sm:$0xff]  }
  0xf4   : > { %2311 = vmatmul.mubr.bf16.vlgmr.msra.gmra.mxu1 %v4133_v63  ;;  %2254 = vmatpush2.bf16.msra.mxu0 %v3498_v62  ;;  %v3563_v62 = vld [vmem:[%s3937_s22 + $0x1a0] ss:$12 sps:$4 sm:$0xff]  }
  0xf5   : > { %3031 = vmatpush3.bf16.msra.mxu1 %v3502_v0  ;;  %2255 = vmatprep.subr.bf16.mxu0 %v3505_v1  ;;  %v3565_v0 = vld [vmem:[%s3937_s22 + $0x320] ss:$12 sps:$4 sm:$0xff]   ;;  %v3566_v1 = vld [vmem:[%s3937_s22 + $0x248] ss:$12 sps:$4 sm:$0xff]  }
  0xf6   : > { %3032 = vmatprep.subr.bf16.mxu1 %v3506_v2  ;;  %2351 = vmatprep.mubr.bf16.mxu1 %v3991_v49  ;;  %v3521_v49 = vld [vmem:[%s3937_s22 + $0x110] ss:$12 sps:$4 sm:$0xff]   ;;  %v3568_v2 = vld [vmem:[%s3937_s22 + $0x3c8] ss:$12 sps:$4 sm:$0xff]  }
  0xf8   : > { %2256 = vmatpush2.bf16.msra.mxu0 %v3503_v3  ;;  %v3567_v3 = vld [vmem:[%s3937_s22 + $0x188] ss:$12 sps:$4 sm:$0xff]  }
  0xf9   : > { %3033 = vmatpush3.bf16.msra.mxu1 %v3507_v4  ;;  %2257 = vmatprep.subr.bf16.mxu0 %v3510_v5  ;;  %v3569_v4 = vld [vmem:[%s3937_s22 + $0x308] ss:$12 sps:$4 sm:$0xff]   ;;  %v3570_v5 = vld [vmem:[%s3937_s22 + $0x5f0] ss:$12 sps:$4 sm:$0xff]  }
  0xfa   : > { %3034 = vmatprep.subr.bf16.mxu1 %v3511_v6  ;;  %v3572_v6 = vld [vmem:[%s3937_s22 + $0x770] ss:$12 sps:$4 sm:$0xff]  }
  0xfc   : > { %2258 = vmatpush2.bf16.msra.mxu0 %v3508_v7  ;;  %v3571_v7 = vld [vmem:[%s3937_s22 + $0x530] ss:$12 sps:$4 sm:$0xff]  }
  0xfd   : > { %3035 = vmatpush3.bf16.msra.mxu1 %v3512_v10  ;;  %2259 = vmatprep.subr.bf16.mxu0 %v3515_v11  ;;  %v3573_v10 = vld [vmem:[%s3937_s22 + $0x6b0] ss:$12 sps:$4 sm:$0xff]   ;;  %v3574_v11 = vld [vmem:[%s3937_s22 + $0x5d8] ss:$12 sps:$4 sm:$0xff]  }
  0xfe   : > { %3036 = vmatprep.subr.bf16.mxu1 %v3516_v12  ;;  %v3576_v12 = vld [vmem:[%s3937_s22 + $0x758] ss:$12 sps:$4 sm:$0xff]  }
 0x100   : > { %2260 = vmatpush2.bf16.msra.mxu0 %v3513_v13  ;;  %v3575_v13 = vld [vmem:[%s3937_s22 + $0x518] ss:$12 sps:$4 sm:$0xff]  }
 0x101   : > { %3037 = vmatpush3.bf16.msra.mxu1 %v3517_v14  ;;  %2261 = vmatprep.subr.bf16.mxu0 %v3520_v15  ;;  %v3577_v14 = vld [vmem:[%s3937_s22 + $0x698] ss:$12 sps:$4 sm:$0xff]   ;;  %v3578_v15 = vld [vmem:[%s3937_s22 + $0x5c0] ss:$12 sps:$4 sm:$0xff]  }
 0x102   : > { %3038 = vmatprep.subr.bf16.mxu1 %v3521_v49  ;;  %v3580_v49 = vld [vmem:[%s3937_s22 + $0x740] ss:$12 sps:$4 sm:$0xff]  }
 0x104   : > { %2262 = vmatpush2.bf16.msra.mxu0 %v3518_v16  ;;  %v3582_v16 = vld [vmem:[%s3937_s22 + $0x5a8] ss:$12 sps:$4 sm:$0xff]  }
 0x105   : > { %3039 = vmatpush3.bf16.msra.mxu1 %v3522_v17  ;;  %2263 = vmatprep.subr.bf16.mxu0 %v3525_v18  ;;  %v3584_v17 = vld [vmem:[%s3937_s22 + $0x728] ss:$12 sps:$4 sm:$0xff]  }
 0x106   : > { %3040 = vmatprep.subr.bf16.mxu1 %v3526_v19  ;;  %v3583_v18 = vld [vmem:[%s3937_s22 + $0x4e8] ss:$12 sps:$4 sm:$0xff]   ;;  %v3588_v19 = vld [vmem:[%s3937_s22 + $0x710] ss:$12 sps:$4 sm:$0xff]  }
 0x108   : > { %2264 = vmatpush2.bf16.msra.mxu0 %v3523_v21  ;;  %v3587_v21 = vld [vmem:[%s3937_s22 + $0x4d0] ss:$12 sps:$4 sm:$0xff]  }
 0x109   : > { %3041 = vmatpush3.bf16.msra.mxu1 %v3527_v23  ;;  %2265 = vmatprep.subr.bf16.mxu0 %v3530_v24  ;;  %v3589_v23 = vld [vmem:[%s3937_s22 + $0x650] ss:$12 sps:$4 sm:$0xff]   ;;  %v3590_v24 = vld [vmem:[%s3937_s22 + $0x578] ss:$12 sps:$4 sm:$0xff]  }
 0x10a   : > { %3042 = vmatprep.subr.bf16.mxu1 %v3531_v25  ;;  %v3592_v25 = vld [vmem:[%s3937_s22 + $0x6f8] ss:$12 sps:$4 sm:$0xff]  }
 0x10c   : > { %2266 = vmatpush2.bf16.msra.mxu0 %v3528_v26  ;;  %v3591_v26 = vld [vmem:[%s3937_s22 + $0x4b8] ss:$12 sps:$4 sm:$0xff]  }
 0x10d   : > { %3043 = vmatpush3.bf16.msra.mxu1 %v3532_v27  ;;  %2267 = vmatprep.subr.bf16.mxu0 %v3535_v28  ;;  %v3593_v27 = vld [vmem:[%s3937_s22 + $0x638] ss:$12 sps:$4 sm:$0xff]   ;;  %v3594_v28 = vld [vmem:[%s3937_s22 + $0x560] ss:$12 sps:$4 sm:$0xff]  }
 0x10e   : > { %3044 = vmatprep.subr.bf16.mxu1 %v3536_v29  ;;  %v3596_v29 = vld [vmem:[%s3937_s22 + $0x6e0] ss:$12 sps:$4 sm:$0xff]  }
 0x110   : > { %2268 = vmatpush2.bf16.msra.mxu0 %v3533_v30  ;;  %v3595_v30 = vld [vmem:[%s3937_s22 + $0x4a0] ss:$12 sps:$4 sm:$0xff]  }
 0x111   : > { %3045 = vmatpush3.bf16.msra.mxu1 %v3537_v31  ;;  %3052 = vmatprep.subr.bf16.mxu0 %v3538_v33  ;;  %v3597_v31 = vld [vmem:[%s3937_s22 + $0x620] ss:$12 sps:$4 sm:$0xff]   ;;  %v3600_v33 = vld [vmem:[%s3937_s22 + $0x6c8] ss:$12 sps:$4 sm:$0xff]  }
 0x112   : > { %3074 = vmatprep.subr.bf16.mxu1 %v3540_v34  ;;  %v3599_v34 = vld [vmem:[%s3937_s22 + $0x488] ss:$12 sps:$4 sm:$0xff]  }
 0x113   : > { %2270 = vmatmul.mubr.bf16.vlgmr.msra.gmra.mxu0 %v4169_v38 }
 0x114   : > { %2352 = vmatmul.mubr.bf16.vlgmr.msra.gmra.mxu1 %v4015_v8  ;;  %3053 = vmatpush3.bf16.msra.mxu0 %v3539_v37  ;;  %v3550_v8 = vld [vmem:[%s3937_s22 + $0x2a8] ss:$12 sps:$4 sm:$0xff]  }
 0x115   : > { %3075 = vmatpush3.bf16.msra.mxu1 %v3541_v39  ;;  %3054 = vmatprep.subr.bf16.mxu0 %v3542_v40  ;;  %v3601_v37 = vld [vmem:[%s3937_s22 + $0x608] ss:$12 sps:$4 sm:$0xff]   ;;  %v3602_v39 = vld [vmem:[%s3937_s22 + $0x830] ss:$12 sps:$4 sm:$0xff]   ;;  %v3785_v40 = vmov 0.0  }
 0x116   : > { %3076 = vmatprep.subr.bf16.mxu1 %v3544_v42  ;;  %2391 = vmatprep.mubr.bf16.mxu0 %v3994_v52  ;;  %v3554_v52 = vld [vmem:[%s3937_s22 + $0x290] ss:$12 sps:$4 sm:$0xff]  }
 0x117   : > { %2431 = vmatprep.mubr.bf16.mxu1 %v4046_v36  ;;  %v3556_v36 = vld [vmem:[%s3937_s22 + $0x410] ss:$12 sps:$4 sm:$0xff]  }
 0x118   : > { %3055 = vmatpush3.bf16.msra.mxu0 %v3543_v43 }
 0x119   : > { %3077 = vmatpush3.bf16.msra.mxu1 %v3545_v44  ;;  %3056 = vmatprep.subr.bf16.mxu0 %v3546_v45  ;;  %v3603_v45 = vld [vmem:[%s3937_s22 + $0x818] ss:$12 sps:$4 sm:$0xff]  }
 0x11a   : > { %3078 = vmatprep.subr.bf16.mxu1 %v3548_v46 }
 0x11c   : > { %3057 = vmatpush3.bf16.msra.mxu0 %v3547_v47 }
 0x11d   : > { %3079 = vmatpush3.bf16.msra.mxu1 %v3549_v48  ;;  %3058 = vmatprep.subr.bf16.mxu0 %v3550_v8 }
 0x11e   : > { %3080 = vmatprep.subr.bf16.mxu1 %v3552_v50 }
 0x120   : > { %3059 = vmatpush3.bf16.msra.mxu0 %v3551_v51  ;;  %v3604_v51 = vld [vmem:[%s3937_s22 + $0x800] ss:$12 sps:$4 sm:$0xff]  }
 0x121   : > { %3081 = vmatpush3.bf16.msra.mxu1 %v3553_v53  ;;  %3060 = vmatprep.subr.bf16.mxu0 %v3554_v52  ;;  %v3605_v53 = vld [vmem:[%s3937_s22 + $0x7e8] ss:$12 sps:$4 sm:$0xff]   ;;  %v3606_v52 = vld [vmem:[%s3937_s22 + $0x7d0] ss:$12 sps:$4 sm:$0xff]  }
 0x122   : > { %3082 = vmatprep.subr.bf16.mxu1 %v3556_v36  ;;  %v3607_v36 = vld [vmem:[%s3937_s22 + $0x7b8] ss:$12 sps:$4 sm:$0xff]  }
 0x124   : > { %3061 = vmatpush3.bf16.msra.mxu0 %v3555_v54  ;;  %v3608_v54 = vld [vmem:[%s3937_s22 + $0x7a0] ss:$12 sps:$4 sm:$0xff]  }
 0x125   : > { %3083 = vmatpush3.bf16.msra.mxu1 %v3557_v55  ;;  %3062 = vmatprep.subr.bf16.mxu0 %v3558_v56  ;;  %v3609_v55 = vld [vmem:[%s3937_s22 + $0x788] ss:$12 sps:$4 sm:$0xff]  }
 0x126   : > { %3084 = vmatprep.subr.bf16.mxu1 %v3560_v57 }
 0x128   : > { %3063 = vmatpush3.bf16.msra.mxu0 %v3559_v58 }
 0x129   : > { %3085 = vmatpush3.bf16.msra.mxu1 %v3561_v59  ;;  %3064 = vmatprep.subr.bf16.mxu0 %v3562_v60 }
 0x12a   : > { %3086 = vmatprep.subr.bf16.mxu1 %v3564_v61 }
 0x12c   : > { %3065 = vmatpush3.bf16.msra.mxu0 %v3563_v62 }
 0x12d   : > { %3087 = vmatpush3.bf16.msra.mxu1 %v3565_v0  ;;  %3066 = vmatprep.subr.bf16.mxu0 %v3566_v1 }
 0x12e   : > { %3088 = vmatprep.subr.bf16.mxu1 %v3568_v2 }
 0x130   : > { %3067 = vmatpush3.bf16.msra.mxu0 %v3567_v3 }
 0x131   : > { %3089 = vmatpush3.bf16.msra.mxu1 %v3569_v4  ;;  %3096 = vmatprep.subr.bf16.mxu0 %v3570_v5 }
 0x132   : > { %3118 = vmatprep.subr.bf16.mxu1 %v3572_v6 }
 0x133   : > { %2392 = vmatmul.mubr.bf16.vlgmr.msra.gmra.mxu0 %v4017_v9  ;;  %v3579_v9 = vld [vmem:[%s3937_s22 + $0x500] ss:$12 sps:$4 sm:$0xff]  }
 0x134   : > { %2432 = vmatmul.mubr.bf16.vlgmr.msra.gmra.mxu1 %v4091_v20  ;;  %3097 = vmatpush3.bf16.msra.mxu0 %v3571_v7  ;;  %v3581_v20 = vld [vmem:[%s3937_s22 + $0x680] ss:$12 sps:$4 sm:$0xff]   ;;  %v2573_v7 = vlaneseq }
 0x135   : > { %3119 = vmatpush3.bf16.msra.mxu1 %v3573_v10  ;;  %3098 = vmatprep.subr.bf16.mxu0 %v3574_v11 }
 0x136   : > { %3120 = vmatprep.subr.bf16.mxu1 %v3576_v12  ;;  %2471 = vmatprep.mubr.bf16.mxu0 %v4051_v41  ;;  %v3585_v41 = vld [vmem:[%s3937_s22 + $0x668] ss:$12 sps:$4 sm:$0xff]   ;;  %v2574_v10 = vshrl.u32 %v2573_v7, 7  ;;  %v2571_v12 = vld [vmem:[%s247_s20] sm:$0x7] }
 0x137   : > { %2511 = vmatprep.mubr.bf16.mxu1 %v4108_v35  ;;  %v3586_v35 = vld [vmem:[%s3937_s22 + $0x590] ss:$12 sps:$4 sm:$0xff]  }
 0x138   : > { %3099 = vmatpush3.bf16.msra.mxu0 %v3575_v13  ;;  %v2579_v13 = vsub.s32 1, %v2574_v10 }
 0x139   : > { %3121 = vmatpush3.bf16.msra.mxu1 %v3577_v14  ;;  %3100 = vmatprep.subr.bf16.mxu0 %v3578_v15 }
 0x13a   : > { %3122 = vmatprep.subr.bf16.mxu1 %v3580_v49 }
 0x13c   : > { %3101 = vmatpush3.bf16.msra.mxu0 %v3579_v9 }
 0x13d   : > { %3123 = vmatpush3.bf16.msra.mxu1 %v3581_v20  ;;  %3102 = vmatprep.subr.bf16.mxu0 %v3582_v16 }
 0x13e   : > { %3124 = vmatprep.subr.bf16.mxu1 %v3584_v17 }
 0x140   : > { %3103 = vmatpush3.bf16.msra.mxu0 %v3583_v18 }
 0x141   : > { %3125 = vmatpush3.bf16.msra.mxu1 %v3585_v41  ;;  %3104 = vmatprep.subr.bf16.mxu0 %v3586_v35  ;;  %v2580_v35 = vrot.slane %v2571_v12, %v2579_v13 }
 0x142   : > { %3126 = vmatprep.subr.bf16.mxu1 %v3588_v19 }
 0x144   : > { %3105 = vmatpush3.bf16.msra.mxu0 %v3587_v21 }
 0x145   : > { %3127 = vmatpush3.bf16.msra.mxu1 %v3589_v23  ;;  %3106 = vmatprep.subr.bf16.mxu0 %v3590_v24 }
 0x146   : > { %3128 = vmatprep.subr.bf16.mxu1 %v3592_v25 }
 0x148   : > { %3107 = vmatpush3.bf16.msra.mxu0 %v3591_v26 }
 0x149   : > { %3129 = vmatpush3.bf16.msra.mxu1 %v3593_v27  ;;  %3108 = vmatprep.subr.bf16.mxu0 %v3594_v28 }
 0x14a   : > { %3130 = vmatprep.subr.bf16.mxu1 %v3596_v29 }
 0x14c   : > { %3109 = vmatpush3.bf16.msra.mxu0 %v3595_v30 }
 0x14d   : > { %3131 = vmatpush3.bf16.msra.mxu1 %v3597_v31  ;;  %3110 = vmatprep.subr.bf16.mxu0 %v3598_v32 }
 0x14e   : > { %3132 = vmatprep.subr.bf16.mxu1 %v3600_v33 }
 0x150   : > { %3111 = vmatpush3.bf16.msra.mxu0 %v3599_v34 }
 0x151   : > { %3133 = vmatpush3.bf16.msra.mxu1 %v3601_v37  ;;  %3149 = vmatprep.subr.bf16.mxu0 %v3785_v40 }
 0x153   : > { %v2107_v42 = vpop.f32.mrf.mxu0  ;;  %2472 = vmatmul.mubr.bf16.vlgmr.msra.gmra.mxu0 %v4094_v22 }
 0x154   : > { %v2148_v43 = vpop.f32.mrf.mxu1  ;;  %2512 = vmatmul.mubr.bf16.vlgmr.msra.gmra.mxu1 %v4169_v38  ;;  %3150 = vmatpush3.bf16.msra.mxu0 %v3602_v39 }
 0x155   : > { %v2149_v44 = vadd.f32 %v2148_v43, %v2107_v42  ;;  %3165 = vmatprep.mubr.msk.bf16.mxu0 %vm3786_vm0, %v3785_v40  ;;  %v2109_v46 = vpop.f32.mrf.mxu0  ;;  %3151 = vmatprep.subr.bf16.mxu0 %v3785_v40 }
 0x156   : > { %v2150_v47 = vpop.f32.mrf.mxu1 }
 0x157   : > { %v2151_v48 = vadd.f32 %v2150_v47, %v2109_v46  ;;  %v2111_v8 = vpop.f32.mrf.mxu0 }
 0x158   : > { %v2152_v50 = vpop.f32.mrf.mxu1  ;;  %3152 = vmatpush3.bf16.msra.mxu0 %v3603_v45 }
 0x159   : > { %v2112_v22 = vpop.f32.mrf.mxu0  ;;  %3153 = vmatprep.subr.bf16.mxu0 %v3785_v40 }
 0x15a   : > { %v2153_v38 = vpop.f32.mrf.mxu1 }
 0x15c   : > { %3154 = vmatpush3.bf16.msra.mxu0 %v3604_v51 }
 0x15d   : > { %3155 = vmatprep.subr.bf16.mxu0 %v3785_v40 }
 0x160   : > { %3156 = vmatpush3.bf16.msra.mxu0 %v3605_v53 }
 0x161   : > { %3157 = vmatprep.subr.bf16.mxu0 %v3785_v40 }
 0x164   : > { %3158 = vmatpush3.bf16.msra.mxu0 %v3606_v52 }
 0x165   : > { %3159 = vmatprep.subr.bf16.mxu0 %v3785_v40 }
 0x168   : > { %3160 = vmatpush3.bf16.msra.mxu0 %v3607_v36 }
 0x169   : > { %3161 = vmatprep.subr.bf16.mxu0 %v3785_v40 }
 0x16c   : > { %3162 = vmatpush3.bf16.msra.mxu0 %v3608_v54  ;;  %v2583_v54 = vsub.s32 2, %v2574_v10 }
 0x16d   : > { %3163 = vmatprep.subr.bf16.mxu0 %v3785_v40 }
 0x170   : > { %3164 = vmatpush3.bf16.msra.mxu0 %v3609_v55 }
 0x173   : > { %3166 = vmatmul.mubr.bf16.vlgmr.msra.gmra.mxu0 %v4133_v63  ;;  %v2575_v63 = vsub.s32 0, %v2574_v10 }
 0x175   : > { %v2576_v20 = vrot.slane %v2571_v12, %v2575_v63 }
 0x193   : > { %v2189_v56 = vpop.f32.mrf.mxu0 }
 0x194   : > { %v2230_v57 = vpop.f32.mrf.mxu1  ;;  %v2190_v58 = vadd.f32 %v2189_v56, %v2149_v44  ;;  %v2584_v56 = vrot.slane %v2571_v12, %v2583_v54 }
 0x195   : > { %v2191_v59 = vpop.f32.mrf.mxu0 }
 0x196   : > { %v2232_v60 = vpop.f32.mrf.mxu1  ;;  %v2231_v61 = vadd.f32 %v2230_v57, %v2190_v58  ;;  %v2192_v11 = vadd.f32 %v2191_v59, %v2151_v48 }
 0x197   : > { %v2193_v62 = vpop.f32.mrf.mxu0 }
 0x198   : > { %v2234_v0 = vpop.f32.mrf.mxu1  ;;  %v2233_v49 = vadd.f32 %v2232_v60, %v2192_v11 }
 0x199   : > { %v2194_v1 = vpop.f32.mrf.mxu0 }
 0x19a   : > { %v2235_v2 = vpop.f32.mrf.mxu1 }
 0x1b4   : > { %v2312_v3 = vpop.f32.mrf.mxu1 }
 0x1b6   : > { %v2314_v4 = vpop.f32.mrf.mxu1 }
 0x1b8   : > { %v2316_v5 = vpop.f32.mrf.mxu1 }
 0x1ba   : > { %v2317_v6 = vpop.f32.mrf.mxu1 }
 0x1d3   : > { %v2271_v14 = vpop.f32.mrf.mxu0 }
 0x1d4   : > { %v3046_v15 = vpop.f32.mrf.mxu1  ;;  %v2272_v9 = vadd.f32 %v2271_v14, %v2231_v61 }
 0x1d5   : > { %v2273_v16 = vpop.f32.mrf.mxu0 }
 0x1d6   : > { %v3047_v17 = vpop.f32.mrf.mxu1  ;;  %v2313_v18 = vadd.f32 %v2312_v3, %v2272_v9  ;;  %v2274_v41 = vadd.f32 %v2273_v16, %v2233_v49 }
 0x1d7   : > { %v3048_v19 = vadd.f32 %v3047_v17, %v3046_v15  ;;  %v2275_v21 = vpop.f32.mrf.mxu0 }
 0x1d8   : > { %v3049_v23 = vpop.f32.mrf.mxu1  ;;  %v2315_v24 = vadd.f32 %v2314_v4, %v2274_v41  ;;  %v2588_v27 = vadd.f32 %v2576_v20, %v2313_v18 }
 0x1d9   : > { %v2276_v25 = vpop.f32.mrf.mxu0 }
 0x1da   : > { %v3050_v26 = vpop.f32.mrf.mxu1  ;;  %v2589_v28 = vadd.f32 %v2580_v35, %v2315_v24 }
 0x1dc   : > { %v3027_v29 = vpack.c.bf16 %v2589_v28, %v2588_v27 }
 0x1de   : > { %2604 = vst [vmem:[%s4253_s28] sm:$0xff] %v3027_v29 }
 0x1f3   : > { %v3068_v30 = vpop.f32.mrf.mxu0 }
 0x1f4   : > { %v3090_v31 = vpop.f32.mrf.mxu1 }
 0x1f5   : > { %v3069_v32 = vpop.f32.mrf.mxu0 }
 0x1f6   : > { %v3091_v33 = vpop.f32.mrf.mxu1  ;;  %v3070_v50 = vadd.f32 %v3069_v32, %v3068_v30 }
 0x1f7   : > { %v3071_v34 = vpop.f32.mrf.mxu0  ;;  %v3092_v22 = vadd.f32 %v3091_v33, %v3090_v31 }
 0x1f8   : > { %v3093_v37 = vpop.f32.mrf.mxu1  ;;  %v2394_v51 = vadd.f32 %v3070_v50, %v3048_v19 }
 0x1f9   : > { %v3072_v39 = vpop.f32.mrf.mxu0 }
 0x1fa   : > { %v3094_v40 = vpop.f32.mrf.mxu1  ;;  %v2434_v53 = vadd.f32 %v3092_v22, %v2394_v51 }
 0x213   : > { %v3112_v42 = vpop.f32.mrf.mxu0 }
 0x214   : > { %v3134_v43 = vpop.f32.mrf.mxu1 }
 0x215   : > { %v3113_v44 = vpop.f32.mrf.mxu0 }
 0x216   : > { %v3135_v45 = vpop.f32.mrf.mxu1  ;;  %v3114_v38 = vadd.f32 %v3113_v44, %v3112_v42 }
 0x217   : > { %v3115_v46 = vpop.f32.mrf.mxu0  ;;  %v3136_v36 = vadd.f32 %v3135_v45, %v3134_v43 }
 0x218   : > { %v3137_v47 = vpop.f32.mrf.mxu1  ;;  %v2474_v52 = vadd.f32 %v3114_v38, %v2434_v53 }
 0x219   : > { %v3116_v48 = vpop.f32.mrf.mxu0 }
 0x21a   : > { %v3138_v8 = vpop.f32.mrf.mxu1  ;;  %v2514_v55 = vadd.f32 %v3136_v36, %v2474_v52 }
 0x233   : > { %v2553_v57 = vpop.f32.mrf.mxu0 }
 0x234   : > { %v2554_v58 = vadd.f32 %v2553_v57, %v2514_v55 }
 0x235   : > { %v3167_v59 = vpop.f32.mrf.mxu0 }
 0x236   : > { %v2590_v60 = vadd.f32 %v2584_v56, %v2554_v58 }
 0x237   : > { %v2556_v61 = vpop.f32.mrf.mxu0 }
 0x238   : > { %v3028_v62 = vpack.c.bf16 %v2590_v60, %v2590_v60 }
 0x239   : > { %v3168_v0 = vpop.f32.mrf.mxu0 }
 0x23a   : > { %2605 = vst [vmem:[%s4253_s28 + $0x8] sm:$0xf] %v3028_v62 }
 0x23b   : > { %3705 = shalt.err (!%p3702_p4)
}
 0x23c   : > { %s3706_s10 = scalar_lea.hbm %s4261_s27, 192  ;;  %s3710_s22 = scalar_lea.hbm %s4306_s3, 576 }
 0x23d   : > { %p3707_p7 = scmp.ne.s32.totalorder %s4261_s27, %s3706_s10  ;;  %p3711_p1 = scmp.lt.s32.totalorder %s4261_s27, %s4306_s3 }
 0x23e   : > { %p3712_p3 = scmp.lt.s32.totalorder %s3710_s22, %s3706_s10 }
 0x23f   : > { %p3708_p11 = pnand %p3707_p7, %p4322_p13 }
 0x240   : > { %p3713_p6 = por %p3712_p3, %p3711_p1 }
 0x241   : > { %p3709_p10 = pneg %p3708_p11 }
 0x243   : > { %p3714_p8 = pnand %p3713_p6, %p3709_p10 }
 0x245   : > { %3717 = shalt.err (!%p3714_p8)
}
 0x246   : > { %3182 = dma.vmem_to_hbm [thread:$0]  (%p4322_p13), %s2624_s11, 192, %s4261_s27, %s2607_s30  }
 0x247 PF: > { %p3202_p5 = scmp.ge.s32.totalorder %s3776_s17, 2  ;;  %s2635_s23 = sand.u32 1, %s3756_s12  }
 0x248   : > { %p4323_p9 = scmp.ne.s32.totalorder %s4315_s26, 0  ;;  %s2636_s28 = scalar_lea.sflag [#allocation5], %s2635_s23 }
 0x24a   : > { %p3196_p12 = pnand %p3202_p5, %p4323_p9 }
 0x24c   : > { %p3197_p0 = pneg %p3196_p12 }
 0x24e   : > { %3751 = dma.done.wait (%p3197_p0), %s2636_s28, 192  }
 0x24f   : > { %3753 = vsyncadd (%p3197_p0), %s2636_s28, 4294967104  ;;  %s20_s17 = sadd.s32 1, %s3776_s17   ;;  %s4324_s12 = smov %s3760_s13 }
 0x250   : > { %p17_p2 = scmp.ge.s32.totalorder %s20_s17, 5   ;;  %s4325_s13 = smov %s3764_s14 }
 0x251   : > { %s4326_s14 = smov %s3855_s24  ;;  %s4327_s15 = smov %s3772_s16 }
 0x252   : > { %s4328_s16 = smov %s4330_s18  ;;  %19 = sbr.rel (!%p17_p2) target bundleno = 7 (0x7), region = 102 }
 0x257   :  { %2641 = vsyncpa [#allocation4], 1 }
 0x258   :  { %2643 = vsyncpa [#allocation4 + $0x1], 1 }
 0x259   :  { %2644 = vsyncpa [#allocation7], 1 }
 0x25a   :  { %2646 = vsyncpa [#allocation7 + $0x1], 1 }
 0x25b   :  { %2647 = vsyncpa [#allocation5], 1 }
 0x25c   :  { %2649 = vsyncpa [#allocation5 + $0x1], 1 }

</bundles_post_ra>
